<compile_context>
chip_gen: v7x
topology: tpu7x:2x2x1
jax: 0.10.0
libtpu: 0.0.40
codegen_flags: <defaults>
</compile_context>

<pallas_src>
import functools

import jax
import jax.numpy as jnp
from jax.experimental import pallas as pl
from jax.experimental.pallas import tpu as pltpu

LANE = 128
A_RESIDENT_MAX_BYTES = 8 * 1024 * 1024      # keep dense A resident below this


def _round_up(v, m):
    return (v + m - 1) // m * m


# ---------------------------------------------------------------------------
# Fused kernel
# ---------------------------------------------------------------------------
def _fused_graphsage_kernel(a_ref, invdeg_ref, x_ref,
                            w1l_ref, w1r_ref, b1_ref,
                            w2l_ref, w2r_ref, b2_ref,
                            w3l_ref, w3r_ref, b3_ref,
                            out_ref, emb_ref, h0_ref, h1_ref, *,
                            tile_rows, nclass, a_resident):
    l = pl.program_id(0)                       # layer: 0, 1, 2 (sequential)
    i = pl.program_id(1)                       # node-row tile
    row0 = pl.multiple_of(i * tile_rows, tile_rows)
    rows = pl.ds(row0, tile_rows)

    # Adjacency row tile (bf16 edge counts) and f32 1/deg for those rows.
    a_tile = a_ref[rows, :] if a_resident else a_ref[...]      # (tile, n_pad)
    inv = invdeg_ref[rows, :]                                   # (tile, 1) f32

    def sage(src_ref, wl_ref, wr_ref, b_ref):
        # Mean aggregation over ALL nodes: (counts @ src) * 1/deg, f32 accumulate.
        agg = jnp.dot(a_tile, src_ref[...],
                      preferred_element_type=jnp.float32) * inv
        # Two bf16 MXU passes (no concat): agg @ W_l + self @ W_r + b.
        h = jnp.dot(agg.astype(jnp.bfloat16), wl_ref[...],
                    preferred_element_type=jnp.float32)
        h = h + jnp.dot(src_ref[rows, :], wr_ref[...],
                        preferred_element_type=jnp.float32)
        return h + b_ref[...]

    @pl.when(l == 0)
    def _():
        h = jnp.maximum(sage(x_ref, w1l_ref, w1r_ref, b1_ref), 0.0)
        h0_ref[rows, :] = h.astype(h0_ref.dtype)
        # NOTE: F.dropout(..., training=False) is identity -> nothing to do.

    @pl.when(l == 1)
    def _():
        h = jnp.maximum(sage(h0_ref, w2l_ref, w2r_ref, b2_ref), 0.0)
        h1_ref[rows, :] = h.astype(h1_ref.dtype)
        emb_ref[...] = h                       # embeddings = relu(conv2), f32

    @pl.when(l == 2)
    def _():
        logits = sage(h1_ref, w3l_ref, w3r_ref, b3_ref)
        # Masked log_softmax over the valid class lanes only.
        col = jax.lax.broadcasted_iota(jnp.int32, logits.shape, 1)
        masked = jnp.where(col < nclass, logits, -1e30)
        m = jnp.max(masked, axis=-1, keepdims=True)
        s = masked - m
        lse = jnp.log(jnp.sum(jnp.exp(s), axis=-1, keepdims=True))
        out_ref[...] = s - lse


# ---------------------------------------------------------------------------
# Wrapper
# ---------------------------------------------------------------------------
def graphsage_forward(x, edge_index, params):
    """GraphSAGE forward. Returns (log_softmax(conv3, dim=1), embeddings)."""
    n, nfeat = x.shape
    nhid = params["w1_l"].shape[1]
    nclass = params["w3_l"].shape[1]

    fin_pad = _round_up(nfeat, LANE)           # per-role lane-dense padding
    nhid_pad = _round_up(nhid, LANE)
    ncls_pad = _round_up(nclass, LANE)
    n_pad = _round_up(n, LANE)
    tile_rows = next(t for t in (512, 256, 128) if n_pad % t == 0)
    n_tiles = n_pad // tile_rows

    # Densified graph: exact bf16 edge counts + f32 reciprocal in-degree.
    # TODO(synk): the edge_index scatter stays as JAX glue (no clean Pallas scatter);
    # bf16 counts are exact only up to 256 parallel edges per (tgt, src) pair.
    src, tgt = edge_index[0], edge_index[1]
    a_cnt = jnp.zeros((n_pad, n_pad), jnp.float32).at[tgt, src].add(1.0)
    deg = jnp.sum(a_cnt, axis=1, keepdims=True)
    inv_deg = jnp.where(deg > 0, 1.0 / jnp.maximum(deg, 1.0), 0.0)   # (n_pad, 1)
    a_cnt = a_cnt.astype(jnp.bfloat16)

    # bf16 features / weights (f32 accumulation happens in-kernel).
    x_pad = (jnp.zeros((n_pad, fin_pad), jnp.float32)
             .at[:n, :nfeat].set(x).astype(jnp.bfloat16))

    def pad_w(w, kp, np_):
        return (jnp.zeros((kp, np_), jnp.float32)
                .at[: w.shape[0], : w.shape[1]].set(w).astype(jnp.bfloat16))

    def pad_b(b, np_):
        return jnp.zeros((1, np_), jnp.float32).at[:, : b.shape[-1]].set(b)

    w1l = pad_w(params["w1_l"], fin_pad, nhid_pad)
    w1r = pad_w(params["w1_r"], fin_pad, nhid_pad)
    w2l = pad_w(params["w2_l"], nhid_pad, nhid_pad)
    w2r = pad_w(params["w2_r"], nhid_pad, nhid_pad)
    w3l = pad_w(params["w3_l"], nhid_pad, ncls_pad)
    w3r = pad_w(params["w3_r"], nhid_pad, ncls_pad)
    b1 = pad_b(params["b1"], nhid_pad)
    b2 = pad_b(params["b2"], nhid_pad)
    b3 = pad_b(params["b3"], ncls_pad)

    a_bytes = 2 * n_pad * n_pad
    a_resident = a_bytes <= A_RESIDENT_MAX_BYTES
    if a_resident:
        # Constant block index -> A is DMA'd once and re-used by all 3 layers.
        a_spec = pl.BlockSpec((n_pad, n_pad), lambda l, i: (0, 0))
    else:
        # TODO(synk): for huge graphs keep A as int8/fp8 in HBM, upcast in-kernel.
        a_spec = pl.BlockSpec((tile_rows, n_pad), lambda l, i: (i, 0))

    def const(shape):
        return pl.BlockSpec(shape, lambda l, i: (0, 0))

    kernel = functools.partial(_fused_graphsage_kernel, tile_rows=tile_rows,
                               nclass=nclass, a_resident=a_resident)

    # Advisory cost estimate.
    w_bytes = 2 * (w1l.size + w1r.size + w2l.size + w2r.size + w3l.size + w3r.size)
    flops = (2 * n_pad * n_pad * (fin_pad + 2 * nhid_pad)
             + 4 * n_pad * (fin_pad * nhid_pad + nhid_pad * nhid_pad
                            + nhid_pad * ncls_pad))
    bytes_accessed = ((1 if a_resident else 3) * a_bytes + x_pad.size * 2
                      + inv_deg.size * 4 + w_bytes
                      + n_pad * (nhid_pad + ncls_pad) * 4)

    # VMEM budget: double-buffered resident inputs + bf16 scratch + output tiles.
    vmem_need = ((2 * a_bytes if a_resident else 4 * tile_rows * n_pad * 2)
                 + 2 * (x_pad.size * 2 + inv_deg.size * 4 + w_bytes
                        + (b1.size + b2.size + b3.size) * 4)
                 + 2 * n_pad * nhid_pad * 2
                 + 2 * tile_rows * (nhid_pad + ncls_pad) * 4)
    vmem_limit = int(min(52 * 1024 * 1024,
                         max(32 * 1024 * 1024, vmem_need + (8 << 20))))

    out, emb = pl.pallas_call(
        kernel,
        out_shape=(jax.ShapeDtypeStruct((n_pad, ncls_pad), jnp.float32),
                   jax.ShapeDtypeStruct((n_pad, nhid_pad), jnp.float32)),
        grid_spec=pltpu.PrefetchScalarGridSpec(
            num_scalar_prefetch=0,
            grid=(3, n_tiles),                                   # (layer, row tile)
            in_specs=[
                a_spec,                                          # adjacency counts
                const((n_pad, 1)),                               # 1/deg (f32)
                const((n_pad, fin_pad)),                         # X (bf16, resident)
                const((fin_pad, nhid_pad)), const((fin_pad, nhid_pad)), const((1, nhid_pad)),
                const((nhid_pad, nhid_pad)), const((nhid_pad, nhid_pad)), const((1, nhid_pad)),
                const((nhid_pad, ncls_pad)), const((nhid_pad, ncls_pad)), const((1, ncls_pad)),
            ],
            out_specs=[
                # log-probs: written only at l==2; pinned to block 0 before that
                # so no unwritten tile is ever flushed to HBM.
                pl.BlockSpec((tile_rows, ncls_pad),
                             lambda l, i: (jnp.where(l == 2, i, 0), 0)),
                # embeddings: written at l==1; pinned afterwards to the last block
                # written so l==2 never flushes an unwritten buffer.
                pl.BlockSpec((tile_rows, nhid_pad),
                             lambda l, i: (jnp.where(l == 1, i,
                                                     jnp.where(l == 2, n_tiles - 1, 0)),
                                           0)),
            ],
            scratch_shapes=[
                pltpu.VMEM((n_pad, nhid_pad), jnp.bfloat16),     # h0 = relu(conv1)
                pltpu.VMEM((n_pad, nhid_pad), jnp.bfloat16),     # h1 = relu(conv2)
            ],
        ),
        compiler_params=pltpu.CompilerParams(
            # Layer l+1 reads ALL row tiles of layer l from per-core VMEM scratch,
            # so neither grid axis may be split across TensorCores.
            # TODO(synk): v7x 2-TC split needs VMEM_SHARED scratch + core barrier.
            dimension_semantics=("arbitrary", "arbitrary"),
            vmem_limit_bytes=vmem_limit,
        ),
        cost_estimate=pl.CostEstimate(flops=flops,
                                      transcendentals=n_pad * ncls_pad,
                                      bytes_accessed=int(bytes_accessed)),
    )(a_cnt, inv_deg, x_pad, w1l, w1r, b1, w2l, w2r, b2, w3l, w3r, b3)

    return out[:n, :nclass], emb[:n, :nhid]


# ---------------------------------------------------------------------------
# Params / reference
# ---------------------------------------------------------------------------
def init_params(key, nfeat, nhid, nclass):
    ks = jax.random.split(key, 9)
    scale = 0.1

    def w(k, fin, fout):
        return (scale * jax.random.normal(k, (fin, fout))).astype(jnp.float32)

    return {
        "w1_l": w(ks[0], nfeat, nhid), "w1_r": w(ks[1], nfeat, nhid),
        "b1": (scale * jax.random.normal(ks[2], (1, nhid))).astype(jnp.float32),
        "w2_l": w(ks[3], nhid, nhid), "w2_r": w(ks[4], nhid, nhid),
        "b2": (scale * jax.random.normal(ks[5], (1, nhid))).astype(jnp.float32),
        "w3_l": w(ks[6], nhid, nclass), "w3_r": w(ks[7], nhid, nclass),
        "b3": (scale * jax.random.normal(ks[8], (1, nclass))).astype(jnp.float32),
    }


def _reference(x, edge_index, params):
    """Pure-JAX f32 reference (matches PyG SAGEConv with aggr='mean')."""
    n = x.shape[0]
    a = jnp.zeros((n, n), jnp.float32).at[edge_index[1], edge_index[0]].add(1.0)
    deg = a.sum(axis=1, keepdims=True)
    a_mean = jnp.where(deg > 0, a / jnp.maximum(deg, 1.0), 0.0)

    def conv(h, wl, wr, b):
        return (a_mean @ h) @ wl + h @ wr + b

    h = jax.nn.relu(conv(x, params["w1_l"], params["w1_r"], params["b1"]))
    h = jax.nn.relu(conv(h, params["w2_l"], params["w2_r"], params["b2"]))
    logits = conv(h, params["w3_l"], params["w3_r"], params["b3"])
    return jax.nn.log_softmax(logits, axis=1), h


if __name__ == "__main__":
    # Small synthetic graph: 32 nodes, 96 directed edges, nfeat=16, nhid=32, nclass=8.
    N, E = 32, 96
    NFEAT, NHID, NCLASS = 16, 32, 8

    key = jax.random.PRNGKey(0)
    k_x, k_src, k_tgt, k_params = jax.random.split(key, 4)

    x = jax.random.normal(k_x, (N, NFEAT), dtype=jnp.float32)
    edge_index = jnp.stack(
        [
            jax.random.randint(k_src, (E,), 0, N, dtype=jnp.int32),   # source
            jax.random.randint(k_tgt, (E,), 0, N, dtype=jnp.int32),   # target
        ],
        axis=0,
    )
    params = init_params(k_params, NFEAT, NHID, NCLASS)

    fwd = jax.jit(graphsage_forward)
    log_probs, embeddings = fwd(x, edge_index, params)
    jax.block_until_ready((log_probs, embeddings))

    assert log_probs.shape == (N, NCLASS)
    assert embeddings.shape == (N, NHID)
    # Rows must sum (in prob space) to ~1.
    assert bool(jnp.allclose(jnp.sum(jnp.exp(log_probs), axis=1), 1.0, atol=1e-4))

    # Numerical check vs pure-JAX f32 reference (bf16 operands -> loose tol).
    ref_lp, ref_emb = _reference(x, edge_index, params)
    assert bool(jnp.allclose(log_probs, ref_lp, atol=5e-2, rtol=5e-2))
    assert bool(jnp.allclose(embeddings, ref_emb, atol=5e-2, rtol=5e-2))

    print("KERNEL_OK")
</pallas_src>

<mosaic_0001>
module attributes {stable_mosaic.version = 11 : i64} {
  func.func private @main(%arg0: i32) attributes {dimension_semantics = [#tpu.dimension_semantics<core_parallel>], iteration_bounds = array<i64: 2>, tpu.core_type = #tpu.core_type<sc_scalar_subcore>, window_params = []} {
    return
  }
}

module attributes {stable_mosaic.version = 11 : i64} {
  func.func private @main(%arg0: i32) attributes {dimension_semantics = [#tpu.dimension_semantics<core_parallel>], iteration_bounds = array<i64: 2>, tpu.core_type = #tpu.core_type<sc_scalar_subcore>, window_params = []} {
    return
  }
}

module attributes {stable_mosaic.version = 11 : i64} {
  func.func @_fused_graphsage_kernel(%arg0: i32, %arg1: i32, %arg2: memref<128x128xbf16, #tpu.memory_space<vmem>>, %arg3: memref<128x1xf32, #tpu.memory_space<vmem>>, %arg4: memref<128x128xbf16, #tpu.memory_space<vmem>>, %arg5: memref<128x128xbf16, #tpu.memory_space<vmem>>, %arg6: memref<128x128xbf16, #tpu.memory_space<vmem>>, %arg7: memref<1x128xf32, #tpu.memory_space<vmem>>, %arg8: memref<128x128xbf16, #tpu.memory_space<vmem>>, %arg9: memref<128x128xbf16, #tpu.memory_space<vmem>>, %arg10: memref<1x128xf32, #tpu.memory_space<vmem>>, %arg11: memref<128x128xbf16, #tpu.memory_space<vmem>>, %arg12: memref<128x128xbf16, #tpu.memory_space<vmem>>, %arg13: memref<1x128xf32, #tpu.memory_space<vmem>>, %arg14: memref<128x128xf32, #tpu.memory_space<vmem>>, %arg15: memref<128x128xf32, #tpu.memory_space<vmem>>, %arg16: memref<128x128xbf16, #tpu.memory_space<vmem>>, %arg17: memref<128x128xbf16, #tpu.memory_space<vmem>>) attributes {dimension_semantics = [#tpu.dimension_semantics<arbitrary>, #tpu.dimension_semantics<arbitrary>], iteration_bounds = array<i64: 3, 1>, scalar_prefetch = 0 : i64, scratch_operands = 2 : i64, tpu.core_type = #tpu.core_type<tc>, window_params = [{pipeline_mode = #tpu.pipeline_mode<synchronous>, transform_indices = @transform_0, window_bounds = array<i64: 128, 128>}, {pipeline_mode = #tpu.pipeline_mode<synchronous>, transform_indices = @transform_1, window_bounds = array<i64: 128, 1>}, {pipeline_mode = #tpu.pipeline_mode<synchronous>, transform_indices = @transform_2, window_bounds = array<i64: 128, 128>}, {pipeline_mode = #tpu.pipeline_mode<synchronous>, transform_indices = @transform_3, window_bounds = array<i64: 128, 128>}, {pipeline_mode = #tpu.pipeline_mode<synchronous>, transform_indices = @transform_4, window_bounds = array<i64: 128, 128>}, {pipeline_mode = #tpu.pipeline_mode<synchronous>, transform_indices = @transform_5, window_bounds = array<i64: 1, 128>}, {pipeline_mode = #tpu.pipeline_mode<synchronous>, transform_indices = @transform_6, window_bounds = array<i64: 128, 128>}, {pipeline_mode = #tpu.pipeline_mode<synchronous>, transform_indices = @transform_7, window_bounds = array<i64: 128, 128>}, {pipeline_mode = #tpu.pipeline_mode<synchronous>, transform_indices = @transform_8, window_bounds = array<i64: 1, 128>}, {pipeline_mode = #tpu.pipeline_mode<synchronous>, transform_indices = @transform_9, window_bounds = array<i64: 128, 128>}, {pipeline_mode = #tpu.pipeline_mode<synchronous>, transform_indices = @transform_10, window_bounds = array<i64: 128, 128>}, {pipeline_mode = #tpu.pipeline_mode<synchronous>, transform_indices = @transform_11, window_bounds = array<i64: 1, 128>}, {transform_indices = @transform_12, window_bounds = array<i64: 128, 128>}, {transform_indices = @transform_13, window_bounds = array<i64: 128, 128>}]} {
    %c128_i32 = arith.constant 128 : i32
    %0 = arith.muli %arg1, %c128_i32 : i32
    %1 = tpu.assume_multiple %0, 128 : i32
    %2 = arith.index_cast %1 : i32 to index
    %c0 = arith.constant 0 : index
    %3 = vector.load %arg2[%2, %c0] : memref<128x128xbf16, #tpu.memory_space<vmem>>, vector<128x128xbf16>
    %4 = arith.index_cast %1 : i32 to index
    %c0_0 = arith.constant 0 : index
    %5 = vector.load %arg3[%4, %c0_0] : memref<128x1xf32, #tpu.memory_space<vmem>>, vector<128x1xf32>
    %c0_i32 = arith.constant 0 : i32
    %6 = arith.cmpi eq, %arg0, %c0_i32 : i32
    %7 = arith.extui %6 : i1 to i32
    %c0_i32_1 = arith.constant 0 : i32
    %8 = arith.cmpi ne, %7, %c0_i32_1 : i32
    scf.if %8 {
      %c0_4 = arith.constant 0 : index
      %c0_5 = arith.constant 0 : index
      %15 = vector.load %arg4[%c0_4, %c0_5] : memref<128x128xbf16, #tpu.memory_space<vmem>>, vector<128x128xbf16>
      %cst = arith.constant dense<0.000000e+00> : vector<128x128xf32>
      %16 = tpu.matmul %3, %15, %cst {dimension_numbers = #tpu.dot_dimension_numbers<[1], [0], [0], [1], [0, 0, 1, 1], [], []>} : vector<128x128xbf16>, vector<128x128xbf16>, vector<128x128xf32> -> vector<128x128xf32>
      %17 = vector.broadcast %5 : vector<128x1xf32> to vector<128x128xf32>
      %18 = arith.mulf %16, %17 : vector<128x128xf32>
      %19 = arith.truncf %18 : vector<128x128xf32> to vector<128x128xbf16>
      %c0_6 = arith.constant 0 : index
      %c0_7 = arith.constant 0 : index
      %20 = vector.load %arg5[%c0_6, %c0_7] : memref<128x128xbf16, #tpu.memory_space<vmem>>, vector<128x128xbf16>
      %cst_8 = arith.constant dense<0.000000e+00> : vector<128x128xf32>
      %21 = tpu.matmul %19, %20, %cst_8 {dimension_numbers = #tpu.dot_dimension_numbers<[1], [0], [0], [1], [0, 0, 1, 1], [], []>} : vector<128x128xbf16>, vector<128x128xbf16>, vector<128x128xf32> -> vector<128x128xf32>
      %22 = arith.index_cast %1 : i32 to index
      %c0_9 = arith.constant 0 : index
      %23 = vector.load %arg4[%22, %c0_9] : memref<128x128xbf16, #tpu.memory_space<vmem>>, vector<128x128xbf16>
      %c0_10 = arith.constant 0 : index
      %c0_11 = arith.constant 0 : index
      %24 = vector.load %arg6[%c0_10, %c0_11] : memref<128x128xbf16, #tpu.memory_space<vmem>>, vector<128x128xbf16>
      %cst_12 = arith.constant dense<0.000000e+00> : vector<128x128xf32>
      %25 = tpu.matmul %23, %24, %cst_12 {dimension_numbers = #tpu.dot_dimension_numbers<[1], [0], [0], [1], [0, 0, 1, 1], [], []>} : vector<128x128xbf16>, vector<128x128xbf16>, vector<128x128xf32> -> vector<128x128xf32>
      %26 = arith.addf %21, %25 : vector<128x128xf32>
      %c0_13 = arith.constant 0 : index
      %c0_14 = arith.constant 0 : index
      %27 = vector.load %arg7[%c0_13, %c0_14] : memref<1x128xf32, #tpu.memory_space<vmem>>, vector<1x128xf32>
      %28 = vector.broadcast %27 : vector<1x128xf32> to vector<128x128xf32>
      %29 = arith.addf %26, %28 : vector<128x128xf32>
      %cst_15 = arith.constant 0.000000e+00 : f32
      %30 = vector.broadcast %cst_15 : f32 to vector<128x128xf32>
      %31 = arith.maximumf %29, %30 : vector<128x128xf32>
      %32 = arith.truncf %31 : vector<128x128xf32> to vector<128x128xbf16>
      %33 = arith.index_cast %1 : i32 to index
      %c0_16 = arith.constant 0 : index
      %34 = vector.load %arg16[%33, %c0_16] : memref<128x128xbf16, #tpu.memory_space<vmem>>, vector<128x128xbf16>
      tpu.vector_store %arg16[%33, %c0_16], %32 {strides = array<i32>} : memref<128x128xbf16, #tpu.memory_space<vmem>>, vector<128x128xbf16>,
    } else {
    }
    %c1_i32 = arith.constant 1 : i32
    %9 = arith.cmpi eq, %arg0, %c1_i32 : i32
    %10 = arith.extui %9 : i1 to i32
    %c0_i32_2 = arith.constant 0 : i32
    %11 = arith.cmpi ne, %10, %c0_i32_2 : i32
    scf.if %11 {
      %c0_4 = arith.constant 0 : index
      %c0_5 = arith.constant 0 : index
      %15 = vector.load %arg16[%c0_4, %c0_5] : memref<128x128xbf16, #tpu.memory_space<vmem>>, vector<128x128xbf16>
      %cst = arith.constant dense<0.000000e+00> : vector<128x128xf32>
      %16 = tpu.matmul %3, %15, %cst {dimension_numbers = #tpu.dot_dimension_numbers<[1], [0], [0], [1], [0, 0, 1, 1], [], []>} : vector<128x128xbf16>, vector<128x128xbf16>, vector<128x128xf32> -> vector<128x128xf32>
      %17 = vector.broadcast %5 : vector<128x1xf32> to vector<128x128xf32>
      %18 = arith.mulf %16, %17 : vector<128x128xf32>
      %19 = arith.truncf %18 : vector<128x128xf32> to vector<128x128xbf16>
      %c0_6 = arith.constant 0 : index
      %c0_7 = arith.constant 0 : index
      %20 = vector.load %arg8[%c0_6, %c0_7] : memref<128x128xbf16, #tpu.memory_space<vmem>>, vector<128x128xbf16>
      %cst_8 = arith.constant dense<0.000000e+00> : vector<128x128xf32>
      %21 = tpu.matmul %19, %20, %cst_8 {dimension_numbers = #tpu.dot_dimension_numbers<[1], [0], [0], [1], [0, 0, 1, 1], [], []>} : vector<128x128xbf16>, vector<128x128xbf16>, vector<128x128xf32> -> vector<128x128xf32>
      %22 = arith.index_cast %1 : i32 to index
      %c0_9 = arith.constant 0 : index
      %23 = vector.load %arg16[%22, %c0_9] : memref<128x128xbf16, #tpu.memory_space<vmem>>, vector<128x128xbf16>
      %c0_10 = arith.constant 0 : index
      %c0_11 = arith.constant 0 : index
      %24 = vector.load %arg9[%c0_10, %c0_11] : memref<128x128xbf16, #tpu.memory_space<vmem>>, vector<128x128xbf16>
      %cst_12 = arith.constant dense<0.000000e+00> : vector<128x128xf32>
      %25 = tpu.matmul %23, %24, %cst_12 {dimension_numbers = #tpu.dot_dimension_numbers<[1], [0], [0], [1], [0, 0, 1, 1], [], []>} : vector<128x128xbf16>, vector<128x128xbf16>, vector<128x128xf32> -> vector<128x128xf32>
      %26 = arith.addf %21, %25 : vector<128x128xf32>
      %c0_13 = arith.constant 0 : index
      %c0_14 = arith.constant 0 : index
      %27 = vector.load %arg10[%c0_13, %c0_14] : memref<1x128xf32, #tpu.memory_space<vmem>>, vector<1x128xf32>
      %28 = vector.broadcast %27 : vector<1x128xf32> to vector<128x128xf32>
      %29 = arith.addf %26, %28 : vector<128x128xf32>
      %cst_15 = arith.constant 0.000000e+00 : f32
      %30 = vector.broadcast %cst_15 : f32 to vector<128x128xf32>
      %31 = arith.maximumf %29, %30 : vector<128x128xf32>
      %32 = arith.truncf %31 : vector<128x128xf32> to vector<128x128xbf16>
      %33 = arith.index_cast %1 : i32 to index
      %c0_16 = arith.constant 0 : index
      %34 = vector.load %arg17[%33, %c0_16] : memref<128x128xbf16, #tpu.memory_space<vmem>>, vector<128x128xbf16>
      tpu.vector_store %arg17[%33, %c0_16], %32 {strides = array<i32>} : memref<128x128xbf16, #tpu.memory_space<vmem>>, vector<128x128xbf16>,
      %c0_17 = arith.constant 0 : index
      %c0_18 = arith.constant 0 : index
      %35 = vector.load %arg15[%c0_17, %c0_18] : memref<128x128xf32, #tpu.memory_space<vmem>>, vector<128x128xf32>
      tpu.vector_store %arg15[%c0_17, %c0_18], %31 {strides = array<i32>} : memref<128x128xf32, #tpu.memory_space<vmem>>, vector<128x128xf32>,
    } else {
    }
    %c2_i32 = arith.constant 2 : i32
    %12 = arith.cmpi eq, %arg0, %c2_i32 : i32
    %13 = arith.extui %12 : i1 to i32
    %c0_i32_3 = arith.constant 0 : i32
    %14 = arith.cmpi ne, %13, %c0_i32_3 : i32
    scf.if %14 {
      %c0_4 = arith.constant 0 : index
      %c0_5 = arith.constant 0 : index
      %15 = vector.load %arg17[%c0_4, %c0_5] : memref<128x128xbf16, #tpu.memory_space<vmem>>, vector<128x128xbf16>
      %cst = arith.constant dense<0.000000e+00> : vector<128x128xf32>
      %16 = tpu.matmul %3, %15, %cst {dimension_numbers = #tpu.dot_dimension_numbers<[1], [0], [0], [1], [0, 0, 1, 1], [], []>} : vector<128x128xbf16>, vector<128x128xbf16>, vector<128x128xf32> -> vector<128x128xf32>
      %17 = vector.broadcast %5 : vector<128x1xf32> to vector<128x128xf32>
      %18 = arith.mulf %16, %17 : vector<128x128xf32>
      %19 = arith.truncf %18 : vector<128x128xf32> to vector<128x128xbf16>
      %c0_6 = arith.constant 0 : index
      %c0_7 = arith.constant 0 : index
      %20 = vector.load %arg11[%c0_6, %c0_7] : memref<128x128xbf16, #tpu.memory_space<vmem>>, vector<128x128xbf16>
      %cst_8 = arith.constant dense<0.000000e+00> : vector<128x128xf32>
      %21 = tpu.matmul %19, %20, %cst_8 {dimension_numbers = #tpu.dot_dimension_numbers<[1], [0], [0], [1], [0, 0, 1, 1], [], []>} : vector<128x128xbf16>, vector<128x128xbf16>, vector<128x128xf32> -> vector<128x128xf32>
      %22 = arith.index_cast %1 : i32 to index
      %c0_9 = arith.constant 0 : index
      %23 = vector.load %arg17[%22, %c0_9] : memref<128x128xbf16, #tpu.memory_space<vmem>>, vector<128x128xbf16>
      %c0_10 = arith.constant 0 : index
      %c0_11 = arith.constant 0 : index
      %24 = vector.load %arg12[%c0_10, %c0_11] : memref<128x128xbf16, #tpu.memory_space<vmem>>, vector<128x128xbf16>
      %cst_12 = arith.constant dense<0.000000e+00> : vector<128x128xf32>
      %25 = tpu.matmul %23, %24, %cst_12 {dimension_numbers = #tpu.dot_dimension_numbers<[1], [0], [0], [1], [0, 0, 1, 1], [], []>} : vector<128x128xbf16>, vector<128x128xbf16>, vector<128x128xf32> -> vector<128x128xf32>
      %26 = arith.addf %21, %25 : vector<128x128xf32>
      %c0_13 = arith.constant 0 : index
      %c0_14 = arith.constant 0 : index
      %27 = vector.load %arg13[%c0_13, %c0_14] : memref<1x128xf32, #tpu.memory_space<vmem>>, vector<1x128xf32>
      %28 = vector.broadcast %27 : vector<1x128xf32> to vector<128x128xf32>
      %29 = arith.addf %26, %28 : vector<128x128xf32>
      %30 = tpu.iota {dimensions = array<i32: 1>} : vector<128x128xi32>
      %c8_i32 = arith.constant 8 : i32
      %31 = vector.broadcast %c8_i32 : i32 to vector<128x128xi32>
      %32 = arith.cmpi slt, %30, %31 : vector<128x128xi32>
      %cst_15 = arith.constant -1.000000e+30 : f32
      %33 = vector.broadcast %cst_15 : f32 to vector<128x128xf32>
      %34 = arith.select %32, %29, %33 : vector<128x128xi1>, vector<128x128xf32>
      %cst_16 = arith.constant dense<0xFF800000> : vector<128xf32>
      %35 = vector.multi_reduction <maximumf>, %34, %cst_16 [1] : vector<128x128xf32> to vector<128xf32>
      %36 = vector.shape_cast %35 : vector<128xf32> to vector<128x1xf32>
      %37 = vector.broadcast %36 : vector<128x1xf32> to vector<128x128xf32>
      %38 = arith.subf %34, %37 : vector<128x128xf32>
      %39 = math.exp %38 : vector<128x128xf32>
      %cst_17 = arith.constant dense<0.000000e+00> : vector<128xf32>
      %40 = vector.multi_reduction <add>, %39, %cst_17 [1] : vector<128x128xf32> to vector<128xf32>
      %41 = vector.shape_cast %40 : vector<128xf32> to vector<128x1xf32>
      %42 = math.log %41 : vector<128x1xf32>
      %43 = vector.broadcast %42 : vector<128x1xf32> to vector<128x128xf32>
      %44 = arith.subf %38, %43 : vector<128x128xf32>
      %c0_18 = arith.constant 0 : index
      %c0_19 = arith.constant 0 : index
      %45 = vector.load %arg14[%c0_18, %c0_19] : memref<128x128xf32, #tpu.memory_space<vmem>>, vector<128x128xf32>
      tpu.vector_store %arg14[%c0_18, %c0_19], %44 {strides = array<i32>} : memref<128x128xf32, #tpu.memory_space<vmem>>, vector<128x128xf32>,
    } else {
    }
    return
  }
  func.func @transform_0(%arg0: i32, %arg1: i32) -> (i32, i32) {
    %c0_i32 = arith.constant 0 : i32
    %c0_i32_0 = arith.constant 0 : i32
    %c0_i32_1 = arith.constant 0 : i32
    return %c0_i32, %c0_i32_0 : i32, i32
  }
  func.func @transform_1(%arg0: i32, %arg1: i32) -> (i32, i32) {
    %c0_i32 = arith.constant 0 : i32
    %c0_i32_0 = arith.constant 0 : i32
    %c0_i32_1 = arith.constant 0 : i32
    return %c0_i32, %c0_i32_0 : i32, i32
  }
  func.func @transform_2(%arg0: i32, %arg1: i32) -> (i32, i32) {
    %c0_i32 = arith.constant 0 : i32
    %c0_i32_0 = arith.constant 0 : i32
    %c0_i32_1 = arith.constant 0 : i32
    return %c0_i32, %c0_i32_0 : i32, i32
  }
  func.func @transform_3(%arg0: i32, %arg1: i32) -> (i32, i32) {
    %c0_i32 = arith.constant 0 : i32
    %c0_i32_0 = arith.constant 0 : i32
    %c0_i32_1 = arith.constant 0 : i32
    return %c0_i32, %c0_i32_0 : i32, i32
  }
  func.func @transform_4(%arg0: i32, %arg1: i32) -> (i32, i32) {
    %c0_i32 = arith.constant 0 : i32
    %c0_i32_0 = arith.constant 0 : i32
    %c0_i32_1 = arith.constant 0 : i32
    return %c0_i32, %c0_i32_0 : i32, i32
  }
  func.func @transform_5(%arg0: i32, %arg1: i32) -> (i32, i32) {
    %c0_i32 = arith.constant 0 : i32
    %c0_i32_0 = arith.constant 0 : i32
    %c0_i32_1 = arith.constant 0 : i32
    return %c0_i32, %c0_i32_0 : i32, i32
  }
  func.func @transform_6(%arg0: i32, %arg1: i32) -> (i32, i32) {
    %c0_i32 = arith.constant 0 : i32
    %c0_i32_0 = arith.constant 0 : i32
    %c0_i32_1 = arith.constant 0 : i32
    return %c0_i32, %c0_i32_0 : i32, i32
  }
  func.func @transform_7(%arg0: i32, %arg1: i32) -> (i32, i32) {
    %c0_i32 = arith.constant 0 : i32
    %c0_i32_0 = arith.constant 0 : i32
    %c0_i32_1 = arith.constant 0 : i32
    return %c0_i32, %c0_i32_0 : i32, i32
  }
  func.func @transform_8(%arg0: i32, %arg1: i32) -> (i32, i32) {
    %c0_i32 = arith.constant 0 : i32
    %c0_i32_0 = arith.constant 0 : i32
    %c0_i32_1 = arith.constant 0 : i32
    return %c0_i32, %c0_i32_0 : i32, i32
  }
  func.func @transform_9(%arg0: i32, %arg1: i32) -> (i32, i32) {
    %c0_i32 = arith.constant 0 : i32
    %c0_i32_0 = arith.constant 0 : i32
    %c0_i32_1 = arith.constant 0 : i32
    return %c0_i32, %c0_i32_0 : i32, i32
  }
  func.func @transform_10(%arg0: i32, %arg1: i32) -> (i32, i32) {
    %c0_i32 = arith.constant 0 : i32
    %c0_i32_0 = arith.constant 0 : i32
    %c0_i32_1 = arith.constant 0 : i32
    return %c0_i32, %c0_i32_0 : i32, i32
  }
  func.func @transform_11(%arg0: i32, %arg1: i32) -> (i32, i32) {
    %c0_i32 = arith.constant 0 : i32
    %c0_i32_0 = arith.constant 0 : i32
    %c0_i32_1 = arith.constant 0 : i32
    return %c0_i32, %c0_i32_0 : i32, i32
  }
  func.func @transform_12(%arg0: i32, %arg1: i32) -> (i32, i32) {
    %c2_i32 = arith.constant 2 : i32
    %0 = arith.cmpi eq, %arg0, %c2_i32 : i32
    %c0_i32 = arith.constant 0 : i32
    %1 = arith.select %0, %arg1, %c0_i32 : i32
    %c0_i32_0 = arith.constant 0 : i32
    %c0_i32_1 = arith.constant 0 : i32
    return %1, %c0_i32_0 : i32, i32
  }
  func.func @transform_13(%arg0: i32, %arg1: i32) -> (i32, i32) {
    %c1_i32 = arith.constant 1 : i32
    %0 = arith.cmpi eq, %arg0, %c1_i32 : i32
    %c2_i32 = arith.constant 2 : i32
    %1 = arith.cmpi eq, %arg0, %c2_i32 : i32
    %c0_i32 = arith.constant 0 : i32
    %c0_i32_0 = arith.constant 0 : i32
    %2 = arith.select %1, %c0_i32, %c0_i32_0 : i32
    %3 = arith.select %0, %arg1, %2 : i32
    %c0_i32_1 = arith.constant 0 : i32
    %c0_i32_2 = arith.constant 0 : i32
    return %3, %c0_i32_1 : i32, i32
  }
}

</mosaic_0001>

<bundles_post_ra>
// kernel: graphsage_forward.1
= control target key start
LH: loop header
LB: loop body
LE: loop exit
PB: predicated region body
PF: predicated region fallthrough
CT: control target
= control target key end

     0   :  { %s3755_s25 = smov 0   ;;  %s3757_s26 = smov 0   ;;  %s4594_s0 = inlined_call_operand.vmem [shape: bf16[128,128], index: 0, kind: input, shape index: {}]   ;;  %s4595_s1 = inlined_call_operand.vmem [shape: f32[128,1], index: 1, kind: input, shape index: {}]   ;;  %s4596_s2 = inlined_call_operand.vmem [shape: bf16[128,128], index: 2, kind: input, shape index: {}]   ;;  %s4597_s3 = inlined_call_operand.vmem [shape: bf16[128,128], index: 3, kind: input, shape index: {}]   ;;  %s4598_s4 = inlined_call_operand.vmem [shape: bf16[128,128], index: 4, kind: input, shape index: {}]   ;;  %s4599_s5 = inlined_call_operand.vmem [shape: f32[1,128], index: 5, kind: input, shape index: {}]   ;;  %s4600_s6 = inlined_call_operand.vmem [shape: bf16[128,128], index: 6, kind: input, shape index: {}]   ;;  %s4601_s7 = inlined_call_operand.vmem [shape: bf16[128,128], index: 7, kind: input, shape index: {}]   ;;  %s4602_s8 = inlined_call_operand.vmem [shape: f32[1,128], index: 8, kind: input, shape index: {}]   ;;  %s4603_s9 = inlined_call_operand.vmem [shape: bf16[128,128], index: 9, kind: input, shape index: {}]   ;;  %s4604_s10 = inlined_call_operand.vmem [shape: bf16[128,128], index: 10, kind: input, shape index: {}]   ;;  %s4605_s11 = inlined_call_operand.vmem [shape: f32[1,128], index: 11, kind: input, shape index: {}]   ;;  %s4606_s12 = inlined_call_operand.vmem [shape: f32[128,128], index: 12, kind: output, shape index: {0}]   ;;  %s4607_s13 = inlined_call_operand.vmem [shape: f32[128,128], index: 13, kind: output, shape index: {1}]  }
   0x1   :  { %s3759_s27 = smov 0  }
   0x2 LB: > { %s36_s28 = sadd.s32 1, %s3676_s26  ;;  %p2868_p0 = scmp.ge.s32.totalorder %s3680_s27, 1  ;;  %s3680_s27 = sphi %s3759_s27, %s24_s27   ;;  %s3676_s26 = sphi %s3757_s26, %s4615_s26   ;;  %s3672_s25 = sphi %s3755_s25, %s4614_s25  }
   0x3   : > { %p38_p1 = scmp.ge.s32.totalorder %s36_s28, 3  ;;  %p400_p2 = scmp.lt.s32.totalorder %s3680_s27, 4 }
   0x5   : > { %s4617_s28 = smov (%p38_p1, %s36_s28), 0  ;;  %p401_p3 = pnand %p2868_p0, %p400_p2 }
   0x7   : > { %404 = sbr.rel (%p401_p3) target bundleno = 1847 (0x737), region = 68 }
   0xe   : > { %v3778_v0 = vld [vmem:[%s4594_s0] sm:$0xf]  ;;  %v3783_v1 = vld [vmem:[%s4594_s0 + $0x4] sm:$0xf]  ;;  %v3788_v2 = vld [vmem:[%s4594_s0 + $0x8] sm:$0xf] }
   0xf   : > { %v3793_v3 = vld [vmem:[%s4594_s0 + $0xc] sm:$0xf]  ;;  %v3798_v4 = vld [vmem:[%s4594_s0 + $0x10] sm:$0xf]  ;;  %v3803_v5 = vld [vmem:[%s4594_s0 + $0x14] sm:$0xf] }
  0x10   : > { %v3808_v6 = vld [vmem:[%s4594_s0 + $0x18] sm:$0xf]  ;;  %v3813_v7 = vld [vmem:[%s4594_s0 + $0x1c] sm:$0xf]  ;;  %v3818_v8 = vld [vmem:[%s4594_s0 + $0x20] sm:$0xf] }
  0x11   : > { %v3823_v9 = vld [vmem:[%s4594_s0 + $0x24] sm:$0xf]  ;;  %v3828_v10 = vld [vmem:[%s4594_s0 + $0x28] sm:$0xf]  ;;  %v3833_v11 = vld [vmem:[%s4594_s0 + $0x2c] sm:$0xf] }
  0x12   : > { %v3838_v12 = vld [vmem:[%s4594_s0 + $0x30] sm:$0xf]  ;;  %v3843_v13 = vld [vmem:[%s4594_s0 + $0x34] sm:$0xf]  ;;  %v3848_v14 = vld [vmem:[%s4594_s0 + $0x38] sm:$0xf] }
  0x13   : > { %4610 = vst [vmem:[#allocation4_spill] sm:$0xff] %v3848_v14  ;;  %v3853_v15 = vld [vmem:[%s4594_s0 + $0x3c] sm:$0xf]  ;;  %v3858_v16 = vld [vmem:[%s4595_s1] sm:$0xff]  ;;  %v3863_v17 = vld [vmem:[%s4595_s1 + $0x8] sm:$0xff]  ;;  %p2869_p4 = scmp.ne.s32.totalorder %s3672_s25, 0 }
  0x14   : > { %4611 = vst [vmem:[#allocation5_spill] sm:$0xff] %v3853_v15  ;;  %v3868_v18 = vld [vmem:[%s4595_s1 + $0x10] sm:$0xff]  ;;  %v3873_v19 = vld [vmem:[%s4595_s1 + $0x18] sm:$0xff]  ;;  %v3878_v20 = vld [vmem:[%s4595_s1 + $0x20] sm:$0xff]  ;;  %v2870_v33 = vcombine.low (!%p2869_p4), %v3778_v0, %v3783_v1  ;;  %v3682_v35 = vmov (!%p2869_p4), 0   ;;  %v2871_v51 = vcombine.low (!%p2869_p4), %v3788_v2, %v3793_v3  ;;  %v2872_v52 = vcombine.low (!%p2869_p4), %v3798_v4, %v3803_v5 }
  0x15   : > { %v3883_v21 = vld [vmem:[%s4595_s1 + $0x28] sm:$0xff]  ;;  %v3888_v22 = vld [vmem:[%s4595_s1 + $0x30] sm:$0xff]  ;;  %v3893_v23 = vld [vmem:[%s4595_s1 + $0x38] sm:$0xff]  ;;  %510 = sbr.rel (%p2869_p4) target bundleno = 523 (0x20b), region = 72  ;;  %3525 = vset.pattern.permute.xlu1 (!%p2869_p4), %v3682_v35  ;;  %3524 = vset.pattern.permute.xlu0 (!%p2869_p4), %v3682_v35  ;;  %v2873_v56 = vcombine.low (!%p2869_p4), %v3808_v6, %v3813_v7  ;;  %v2874_v57 = vcombine.low (!%p2869_p4), %v3818_v8, %v3823_v9  ;;  %v2875_v62 = vcombine.low (!%p2869_p4), %v3828_v10, %v3833_v11 }
  0x16   : > { %v3898_v24 = vld [vmem:[%s4595_s1 + $0x40] sm:$0xff]  ;;  %v3903_v25 = vld [vmem:[%s4595_s1 + $0x48] sm:$0xff]  ;;  %v3908_v26 = vld [vmem:[%s4595_s1 + $0x50] sm:$0xff]  ;;  %3129 = vmatprep.mubr.bf16.mxu0 (!%p2869_p4), %v2870_v33  ;;  %732 = vperm.xlu1 (!%p2869_p4), %3525, %v3868_v18   ;;  %v2876_v63 = vcombine.low (!%p2869_p4), %v3838_v12, %v3843_v13 }
  0x17   : > { %v3913_v27 = vld [vmem:[%s4595_s1 + $0x58] sm:$0xff]  ;;  %v3918_v28 = vld [vmem:[%s4595_s1 + $0x60] sm:$0xff]  ;;  %v3923_v29 = vld [vmem:[%s4595_s1 + $0x68] sm:$0xff]  ;;  %722 = vperm.xlu0 (!%p2869_p4), %3524, %v3858_v16  }
  0x18   : > { %v3928_v30 = vld [vmem:[%s4595_s1 + $0x70] sm:$0xff]  ;;  %v3933_v31 = vld [vmem:[%s4595_s1 + $0x78] sm:$0xff]  ;;  %v3526_v32 = vld [vmem:[%s4596_s2] sm:$0xff] (!%p2869_p4)  }
  0x19   : > { %v3527_v34 = vld [vmem:[%s4596_s2 + $0x8] sm:$0xff] (!%p2869_p4)   ;;  %3113 = vmatprep.subr.bf16.mxu0 (!%p2869_p4), %v3526_v32  ;;  %v3528_v36 = vld [vmem:[%s4596_s2 + $0x10] sm:$0xff] (!%p2869_p4)   ;;  %v3529_v37 = vld [vmem:[%s4596_s2 + $0x18] sm:$0xff] (!%p2869_p4)  }
  0x1a   : > { %3114 = vmatpush3.bf16.msra.mxu0 (!%p2869_p4), %v3526_v32  ;;  %v3534_v38 = vld [vmem:[%s4598_s4] sm:$0xff] (!%p2869_p4)   ;;  %737 = vperm.xlu1 (!%p2869_p4), %3525, %v3873_v19   ;;  %v3535_v39 = vld [vmem:[%s4598_s4 + $0x8] sm:$0xff] (!%p2869_p4)   ;;  %v3536_v41 = vld [vmem:[%s4598_s4 + $0x10] sm:$0xff] (!%p2869_p4)  }
  0x1b   : > { %3115 = vmatprep.subr.bf16.mxu0 (!%p2869_p4), %v3527_v34  ;;  %727 = vperm.xlu0 (!%p2869_p4), %3524, %v3863_v17   ;;  %v3530_v40 = vld [vmem:[%s4596_s2 + $0x20] sm:$0xff] (!%p2869_p4)   ;;  %v3531_v42 = vld [vmem:[%s4596_s2 + $0x28] sm:$0xff] (!%p2869_p4)   ;;  %v3537_v43 = vld [vmem:[%s4598_s4 + $0x18] sm:$0xff] (!%p2869_p4)  }
  0x1c   : > { %3145 = vmatprep.subr.bf16.mxu1 %v3534_v38  ;;  %v3532_v44 = vld [vmem:[%s4596_s2 + $0x30] sm:$0xff]   ;;  %v3538_v45 = vld [vmem:[%s4598_s4 + $0x20] sm:$0xff]   ;;  %v3533_v47 = vld [vmem:[%s4596_s2 + $0x38] sm:$0xff]  }
  0x1d   : > { %3146 = vmatpush3.bf16.msra.mxu1 %v3534_v38  ;;  %v3545_v46 = vld [vmem:[%s4596_s2] sm:$0xff]   ;;  %v3540_v48 = vld [vmem:[%s4598_s4 + $0x28] sm:$0xff]   ;;  %v3542_v50 = vld [vmem:[%s4598_s4 + $0x30] sm:$0xff]  }
  0x1e   : > { %3116 = vmatpush3.bf16.msra.mxu0 %v3527_v34  ;;  %3147 = vmatprep.subr.bf16.mxu1 %v3535_v39  ;;  %v3539_v49 = vld [vmem:[%s4597_s3] sm:$0xff]   ;;  %v3541_v53 = vld [vmem:[%s4597_s3 + $0x8] sm:$0xff]   ;;  %v3544_v54 = vld [vmem:[%s4598_s4 + $0x38] sm:$0xff]   ;;  %v2877_v34 = vcombine.low %v3848_v14, %v3853_v15 }
  0x1f   : > { %3117 = vmatprep.subr.bf16.mxu0 %v3528_v36  ;;  %767 = vperm.xlu1 %3525, %v3903_v25   ;;  %v3543_v55 = vld [vmem:[%s4597_s3 + $0x10] sm:$0xff]   ;;  %v3546_v58 = vld [vmem:[%s4597_s3 + $0x18] sm:$0xff]   ;;  %v3547_v59 = vld [vmem:[%s4596_s2 + $0x8] sm:$0xff]  }
  0x20   : > { %762 = vperm.xlu0 %3524, %v3898_v24   ;;  %3161 = vmatprep.mubr.bf16.mxu1 %v3545_v46  ;;  %v3549_v60 = vld [vmem:[%s4596_s2 + $0x10] sm:$0xff]   ;;  %v3548_v61 = vld [vmem:[%s4597_s3 + $0x20] sm:$0xff]   ;;  %v3550_v32 = vld [vmem:[%s4597_s3 + $0x28] sm:$0xff]  }
  0x21   : > { %3148 = vmatpush3.bf16.msra.mxu1 %v3535_v39  ;;  %v3551_v33 = vld [vmem:[%s4596_s2 + $0x18] sm:$0xff]   ;;  %v3552_v35 = vld [vmem:[%s4597_s3 + $0x30] sm:$0xff]   ;;  %v3555_v38 = vld [vmem:[%s4596_s2 + $0x28] sm:$0xff]  }
  0x22   : > { %3118 = vmatpush3.bf16.msra.mxu0 %v3528_v36  ;;  %3149 = vmatprep.subr.bf16.mxu1 %v3536_v41  ;;  %v3553_v36 = vld [vmem:[%s4597_s3 + $0x38] sm:$0xff]   ;;  %v3556_v39 = vld [vmem:[%s4596_s2 + $0x30] sm:$0xff]  }
  0x23   : > { %3119 = vmatprep.subr.bf16.mxu0 %v3529_v37  ;;  %777 = vperm.xlu1 %3525, %v3913_v27  }
  0x24   : > { %772 = vperm.xlu0 %3524, %v3908_v26  }
  0x25   : > { %3150 = vmatpush3.bf16.msra.mxu1 %v3536_v41 }
  0x26   : > { %3120 = vmatpush3.bf16.msra.mxu0 %v3529_v37  ;;  %3151 = vmatprep.subr.bf16.mxu1 %v3537_v43  ;;  %v3554_v37 = vld [vmem:[%s4596_s2 + $0x20] sm:$0xff]  }
  0x27   : > { %3121 = vmatprep.subr.bf16.mxu0 %v3530_v40  ;;  %747 = vperm.xlu1 %3525, %v3883_v21  }
  0x28   : > { %742 = vperm.xlu0 %3524, %v3878_v20  }
  0x29   : > { %3152 = vmatpush3.bf16.msra.mxu1 %v3537_v43 }
  0x2a   : > { %3122 = vmatpush3.bf16.msra.mxu0 %v3530_v40  ;;  %3153 = vmatprep.subr.bf16.mxu1 %v3538_v45  ;;  %v3557_v40 = vld [vmem:[%s4596_s2 + $0x38] sm:$0xff]  }
  0x2b   : > { %3123 = vmatprep.subr.bf16.mxu0 %v3531_v42  ;;  %757 = vperm.xlu1 %3525, %v3893_v23  }
  0x2c   : > { %752 = vperm.xlu0 %3524, %v3888_v22  }
  0x2d   : > { %3154 = vmatpush3.bf16.msra.mxu1 %v3538_v45 }
  0x2e   : > { %3124 = vmatpush3.bf16.msra.mxu0 %v3531_v42  ;;  %3155 = vmatprep.subr.bf16.mxu1 %v3540_v48 }
  0x2f   : > { %3125 = vmatprep.subr.bf16.mxu0 %v3532_v44  ;;  %787 = vperm.xlu1 %3525, %v3923_v29  }
  0x30   : > { %782 = vperm.xlu0 %3524, %v3918_v28  }
  0x31   : > { %3156 = vmatpush3.bf16.msra.mxu1 %v3540_v48 }
  0x32   : > { %3126 = vmatpush3.bf16.msra.mxu0 %v3532_v44  ;;  %3157 = vmatprep.subr.bf16.mxu1 %v3542_v50 }
  0x33   : > { %3127 = vmatprep.subr.bf16.mxu0 %v3533_v47  ;;  %797 = vperm.xlu1 %3525, %v3933_v31  }
  0x34   : > { %792 = vperm.xlu0 %3524, %v3928_v30  }
  0x35   : > { %3158 = vmatpush3.bf16.msra.mxu1 %v3542_v50 }
  0x36   : > { %3128 = vmatpush3.bf16.msra.mxu0 %v3533_v47  ;;  %3159 = vmatprep.subr.bf16.mxu1 %v3544_v54 }
  0x37   : > { %3177 = vmatprep.subr.bf16.mxu0 %v3539_v49 }
  0x39   : > { %3130 = vmatmul.mubr.bf16.vlgmr.msra.gmra.mrb[0].mxu0 %v2871_v51  ;;  %3160 = vmatpush3.bf16.msra.mxu1 %v3544_v54 }
  0x3a   : > { %3133 = vmatprep.mubr.bf16.mxu0 %v2872_v52  ;;  %3178 = vmatpush3.bf16.msra.mxu0 %v3539_v49 }
  0x3b   : > { %3179 = vmatprep.subr.bf16.mxu0 %v3541_v53  ;;  %3401 = vmatprep.subr.bf16.mxu1 %v3539_v49 }
  0x3c   : > { %3162 = vmatmul.mubr.bf16.vlgmr.msra.gmra.mrb[0].mxu1 %v3547_v59 }
  0x3d   : > { %3409 = vmatpush3.bf16.msra.mxu1 %v3539_v49  ;;  %3165 = vmatprep.mubr.bf16.mxu1 %v3549_v60 }
  0x3e   : > { %3180 = vmatpush3.bf16.msra.mxu0 %v3541_v53  ;;  %3402 = vmatprep.subr.bf16.mxu1 %v3541_v53 }
  0x3f   : > { %3181 = vmatprep.subr.bf16.mxu0 %v3543_v55 }
  0x41   : > { %3134 = vmatmul.mubr.bf16.gmra.mrb[4].mxu0 %v2873_v56  ;;  %3410 = vmatpush3.bf16.msra.mxu1 %v3541_v53 }
  0x42   : > { %3137 = vmatprep.mubr.bf16.mxu0 %v2874_v57  ;;  %3182 = vmatpush3.bf16.msra.mxu0 %v3543_v55 }
  0x43   : > { %3183 = vmatprep.subr.bf16.mxu0 %v3546_v58  ;;  %3403 = vmatprep.subr.bf16.mxu1 %v3543_v55 }
  0x44   : > { %3166 = vmatmul.mubr.bf16.gmra.mrb[4].mxu1 %v3551_v33 }
  0x45   : > { %3411 = vmatpush3.bf16.msra.mxu1 %v3543_v55  ;;  %3169 = vmatprep.mubr.bf16.mxu1 %v3554_v37 }
  0x46   : > { %3184 = vmatpush3.bf16.msra.mxu0 %v3546_v58  ;;  %3404 = vmatprep.subr.bf16.mxu1 %v3546_v58 }
  0x47   : > { %3185 = vmatprep.subr.bf16.mxu0 %v3548_v61 }
  0x49   : > { %3138 = vmatmul.mubr.bf16.gmra.mrb[8].mxu0 %v2875_v62  ;;  %3412 = vmatpush3.bf16.msra.mxu1 %v3546_v58 }
  0x4a   : > { %3141 = vmatprep.mubr.bf16.mxu0 %v2876_v63  ;;  %3186 = vmatpush3.bf16.msra.mxu0 %v3548_v61 }
  0x4b   : > { %3187 = vmatprep.subr.bf16.mxu0 %v3550_v32  ;;  %3405 = vmatprep.subr.bf16.mxu1 %v3548_v61 }
  0x4c   : > { %3170 = vmatmul.mubr.bf16.gmra.mrb[8].mxu1 %v3555_v38 }
  0x4d   : > { %3413 = vmatpush3.bf16.msra.mxu1 %v3548_v61  ;;  %3173 = vmatprep.mubr.bf16.mxu1 %v3556_v39 }
  0x4e   : > { %3188 = vmatpush3.bf16.msra.mxu0 %v3550_v32  ;;  %3406 = vmatprep.subr.bf16.mxu1 %v3550_v32 }
  0x4f   : > { %3189 = vmatprep.subr.bf16.mxu0 %v3552_v35 }
  0x51   : > { %3142 = vmatmul.mubr.bf16.gmra.mrb[12].mxu0 %v2877_v34  ;;  %3414 = vmatpush3.bf16.msra.mxu1 %v3550_v32 }
  0x52   : > { %3407 = vmatprep.subr.bf16.mxu1 %v3552_v35  ;;  %3190 = vmatpush3.bf16.msra.mxu0 %v3552_v35 }
  0x53   : > { %3191 = vmatprep.subr.bf16.mxu0 %v3553_v36 }
  0x54   : > { %3174 = vmatmul.mubr.bf16.gmra.mrb[12].mxu1 %v3557_v40 }
  0x55   : > { %3415 = vmatpush3.bf16.msra.mxu1 %v3552_v35 }
  0x56   : > { %3408 = vmatprep.subr.bf16.mxu1 %v3553_v36  ;;  %3192 = vmatpush3.bf16.msra.mxu0 %v3553_v36 }
  0x59   : > { %3416 = vmatpush3.bf16.msra.mxu1 %v3553_v36 }
  0x95   : > { %v733_v41 = vpop.permute.xlu1 %732 }
  0x96   : > { %v723_v42 = vpop.permute.xlu0 %722 }
  0x99   : > { %v738_v43 = vpop.permute.xlu1 %737 }
  0x9a   : > { %v728_v44 = vpop.permute.xlu0 %727 }
  0x9e   : > { %v768_v45 = vpop.permute.xlu1 %767 }
  0x9f   : > { %v763_v46 = vpop.permute.xlu0 %762 }
  0xa2   : > { %v778_v47 = vpop.permute.xlu1 %777 }
  0xa3   : > { %v773_v48 = vpop.permute.xlu0 %772 }
  0xa6   : > { %v748_v51 = vpop.permute.xlu1 %747 }
  0xa7   : > { %v743_v53 = vpop.permute.xlu0 %742 }
  0xaa   : > { %v758_v61 = vpop.permute.xlu1 %757 }
  0xab   : > { %v753_v63 = vpop.permute.xlu0 %752 }
 0x10c   : > { %v3131_v49 = vpop.f32.mrb[0].mxu0 }
 0x10d   : > { %v657_v50 = vpop.f32.mrb[1].mxu0  ;;  %v802_v54 = vmul.f32 %v3131_v49, %v733_v41 }
 0x10e   : > { %v3132_v52 = vpop.f32.mrb[2].mxu0  ;;  %v800_v57 = vmul.f32 %v723_v42, %v657_v50  ;;  %v788_v50 = vpop.permute.xlu1 %787 }
 0x10f   : > { %v803_v55 = vmul.f32 %v3132_v52, %v738_v43  ;;  %v660_v56 = vpop.f32.mrb[3].mxu0  ;;  %v3163_v34 = vpop.f32.mrb[0].mxu1 }
 0x110   : > { %v801_v58 = vmul.f32 %v728_v44, %v660_v56  ;;  %v1004_v38 = vpop.f32.mrb[1].mxu1 }
 0x111   : > { %v817_v59 = vpack.c.bf16 %v803_v55, %v802_v54  ;;  %v3164_v41 = vpop.f32.mrb[2].mxu1 }
 0x112   : > { %v816_v60 = vpack.c.bf16 %v801_v58, %v800_v57  ;;  %v1007_v42 = vpop.f32.mrb[3].mxu1 }
 0x114   : > { %v3135_v62 = vpop.f32.mrb[4].mxu0  ;;  %3193 = vmatprep.mubr.bf16.mxu0 %v816_v60  ;;  %v783_v60 = vpop.permute.xlu0 %782 }
 0x115   : > { %v673_v32 = vpop.f32.mrb[5].mxu0  ;;  %3194 = vmatmul.mubr.bf16.vlgmr.msra.gmra.mrb[16].mxu0 %v817_v59  ;;  %v806_v35 = vmul.f32 %v3135_v62, %v753_v63 }
 0x116   : > { %v3136_v33 = vpop.f32.mrb[6].mxu0  ;;  %v804_v39 = vmul.f32 %v743_v53, %v673_v32 }
 0x117   : > { %v807_v36 = vmul.f32 %v3136_v33, %v758_v61  ;;  %v676_v37 = vpop.f32.mrb[7].mxu0  ;;  %v3167_v55 = vpop.f32.mrb[4].mxu1 }
 0x118   : > { %v805_v40 = vmul.f32 %v748_v51, %v676_v37  ;;  %v1020_v59 = vpop.f32.mrb[5].mxu1  ;;  %v793_v37 = vpop.permute.xlu0 %792 }
 0x119   : > { %v819_v43 = vpack.c.bf16 %v807_v36, %v806_v35  ;;  %v3168_v53 = vpop.f32.mrb[6].mxu1  ;;  %v798_v35 = vpop.permute.xlu1 %797 }
 0x11a   : > { %v818_v44 = vpack.c.bf16 %v805_v40, %v804_v39  ;;  %v1023_v63 = vpop.f32.mrb[7].mxu1 }
 0x11c   : > { %v3139_v49 = vpop.f32.mrb[8].mxu0  ;;  %3197 = vmatprep.mubr.bf16.mxu0 %v818_v44 }
 0x11d   : > { %v689_v52 = vpop.f32.mrb[9].mxu0  ;;  %3198 = vmatmul.mubr.bf16.gmra.mrb[20].mxu0 %v819_v43  ;;  %v810_v56 = vmul.f32 %v3139_v49, %v773_v48 }
 0x11e   : > { %v3140_v54 = vpop.f32.mrb[10].mxu0  ;;  %v808_v61 = vmul.f32 %v763_v46, %v689_v52  ;;  %v4067_v46 = vld [vmem:[%s4599_s5] ss:$0 sm:$0xff] }
 0x11f   : > { %v811_v57 = vmul.f32 %v3140_v54, %v778_v47  ;;  %v692_v58 = vpop.f32.mrb[11].mxu0 }
 0x120   : > { %v809_v62 = vmul.f32 %v768_v45, %v692_v58 }
 0x121   : > { %v821_v51 = vpack.c.bf16 %v811_v57, %v810_v56 }
 0x122   : > { %v820_v32 = vpack.c.bf16 %v809_v62, %v808_v61 }
 0x124   : > { %v3143_v33 = vpop.f32.mrb[12].mxu0  ;;  %3201 = vmatprep.mubr.bf16.mxu1 %v820_v32 }
 0x125   : > { %v705_v36 = vpop.f32.mrb[13].mxu0  ;;  %3202 = vmatmul.mubr.bf16.vlgmr.msra.gmra.mrb[8].mxu1 %v821_v51  ;;  %v814_v40 = vmul.f32 %v3143_v33, %v793_v37 }
 0x126   : > { %v3144_v39 = vpop.f32.mrb[14].mxu0  ;;  %v812_v47 = vmul.f32 %v783_v60, %v705_v36 }
 0x127   : > { %v815_v43 = vmul.f32 %v3144_v39, %v798_v35  ;;  %v708_v48 = vpop.f32.mrb[15].mxu0 }
 0x128   : > { %v813_v44 = vmul.f32 %v788_v50, %v708_v48 }
 0x129   : > { %v823_v49 = vpack.c.bf16 %v815_v43, %v814_v40 }
 0x12a   : > { %v822_v54 = vpack.c.bf16 %v813_v44, %v812_v47 }
 0x12c   : > { %3205 = vmatprep.mubr.bf16.mxu1 %v822_v54 }
 0x12d   : > { %3206 = vmatmul.mubr.bf16.gmra.mrb[12].mxu1 %v823_v49 }
 0x1e8   : > { %v3195_v45 = vpop.f32.mrb[16].mxu0 }
 0x1e9   : > { %v1158_v52 = vadd.f32 %v3195_v45, %v3163_v34  ;;  %v1149_v56 = vpop.f32.mrb[17].mxu0 }
 0x1ea   : > { %v1150_v57 = vadd.f32 %v1149_v56, %v1004_v38  ;;  %v3196_v58 = vpop.f32.mrb[18].mxu0 }
 0x1eb   : > { %v1221_v61 = vadd.f32 %v4067_v46, %v1158_v52  ;;  %v1161_v62 = vadd.f32 %v3196_v58, %v3164_v41  ;;  %v1152_v51 = vpop.f32.mrb[19].mxu0 }
 0x1ec   : > { %v1219_v50 = vadd.f32 %v4067_v46, %v1150_v57  ;;  %v1153_v60 = vadd.f32 %v1152_v51, %v1007_v42 }
 0x1ed   : > { %v1222_v32 = vadd.f32 %v4067_v46, %v1161_v62  ;;  %v1237_v35 = vmax.f32 %v1221_v61, 0.0 }
 0x1ee   : > { %v1220_v33 = vadd.f32 %v4067_v46, %v1153_v60  ;;  %v1235_v37 = vmax.f32 %v1219_v50, 0.0 }
 0x1ef   : > { %v1238_v36 = vmax.f32 %v1222_v32, 0.0 }
 0x1f0   : > { %v1236_v39 = vmax.f32 %v1220_v33, 0.0  ;;  %v3199_v40 = vpop.f32.mrb[20].mxu0 }
 0x1f1   : > { %v1252_v34 = vpack.c.bf16 %v1238_v36, %v1237_v35  ;;  %v1174_v43 = vadd.f32 %v3199_v40, %v3167_v55  ;;  %v1165_v38 = vpop.f32.mrb[21].mxu0 }
 0x1f2   : > { %v1251_v48 = vpack.c.bf16 %v1236_v39, %v1235_v37  ;;  %v1166_v47 = vadd.f32 %v1165_v38, %v1020_v59  ;;  %v3200_v44 = vpop.f32.mrb[22].mxu0 }
 0x1f3   : > { %1264 = vst [vmem:[#allocation2 + $0x8] sm:$0xff] %v1252_v34  ;;  %v1225_v41 = vadd.f32 %v4067_v46, %v1174_v43  ;;  %v1177_v49 = vadd.f32 %v3200_v44, %v3168_v53  ;;  %v1168_v42 = vpop.f32.mrb[23].mxu0 }
 0x1f4   : > { %1263 = vst [vmem:[#allocation2] sm:$0xff] %v1251_v48  ;;  %v1223_v54 = vadd.f32 %v4067_v46, %v1166_v47  ;;  %v1169_v45 = vadd.f32 %v1168_v42, %v1023_v63 }
 0x1f5   : > { %v1226_v52 = vadd.f32 %v4067_v46, %v1177_v49  ;;  %v1241_v57 = vmax.f32 %v1225_v41, 0.0 }
 0x1f6   : > { %v1224_v56 = vadd.f32 %v4067_v46, %v1169_v45  ;;  %v1239_v55 = vmax.f32 %v1223_v54, 0.0 }
 0x1f7   : > { %v1242_v58 = vmax.f32 %v1226_v52, 0.0 }
 0x1f8   : > { %v1240_v61 = vmax.f32 %v1224_v56, 0.0  ;;  %v3203_v62 = vpop.f32.mrb[8].mxu1 }
 0x1f9   : > { %v1254_v59 = vpack.c.bf16 %v1242_v58, %v1241_v57  ;;  %v1229_v51 = vadd.f32 %v3203_v62, %v4067_v46  ;;  %v1181_v50 = vpop.f32.mrb[9].mxu1 }
 0x1fa   : > { %v1253_v60 = vpack.c.bf16 %v1240_v61, %v1239_v55  ;;  %v1227_v53 = vadd.f32 %v4067_v46, %v1181_v50  ;;  %v3204_v32 = vpop.f32.mrb[10].mxu1 }
 0x1fb   : > { %1266 = vst [vmem:[#allocation2 + $0x18] sm:$0xff] %v1254_v59  ;;  %v1230_v63 = vadd.f32 %v3204_v32, %v4067_v46  ;;  %v1184_v33 = vpop.f32.mrb[11].mxu1  ;;  %v1245_v36 = vmax.f32 %v1229_v51, 0.0 }
 0x1fc   : > { %1265 = vst [vmem:[#allocation2 + $0x10] sm:$0xff] %v1253_v60  ;;  %v1228_v35 = vadd.f32 %v4067_v46, %v1184_v33  ;;  %v1243_v39 = vmax.f32 %v1227_v53, 0.0 }
 0x1fd   : > { %v1246_v37 = vmax.f32 %v1230_v63, 0.0 }
 0x1fe   : > { %v1244_v40 = vmax.f32 %v1228_v35, 0.0 }
 0x1ff   : > { %v1256_v34 = vpack.c.bf16 %v1246_v37, %v1245_v36 }
 0x200   : > { %v1255_v43 = vpack.c.bf16 %v1244_v40, %v1243_v39  ;;  %v3207_v38 = vpop.f32.mrb[12].mxu1 }
 0x201   : > { %1268 = vst [vmem:[#allocation2 + $0x28] sm:$0xff] %v1256_v34  ;;  %v1233_v48 = vadd.f32 %v3207_v38, %v4067_v46  ;;  %v1197_v47 = vpop.f32.mrb[13].mxu1 }
 0x202   : > { %1267 = vst [vmem:[#allocation2 + $0x20] sm:$0xff] %v1255_v43  ;;  %v1231_v44 = vadd.f32 %v4067_v46, %v1197_v47  ;;  %v3208_v41 = vpop.f32.mrb[14].mxu1 }
 0x203   : > { %v1234_v49 = vadd.f32 %v3208_v41, %v4067_v46  ;;  %v1200_v42 = vpop.f32.mrb[15].mxu1  ;;  %v1249_v45 = vmax.f32 %v1233_v48, 0.0 }
 0x204   : > { %v1232_v54 = vadd.f32 %v4067_v46, %v1200_v42  ;;  %v1247_v56 = vmax.f32 %v1231_v44, 0.0 }
 0x205   : > { %v1250_v52 = vmax.f32 %v1234_v49, 0.0 }
 0x206   : > { %v1248_v57 = vmax.f32 %v1232_v54, 0.0 }
 0x207   : > { %v1258_v58 = vpack.c.bf16 %v1250_v52, %v1249_v45 }
 0x208   : > { %v1257_v55 = vpack.c.bf16 %v1248_v57, %v1247_v56 }
 0x209   : > { %1270 = vst [vmem:[#allocation2 + $0x38] sm:$0xff] %v1258_v58 }
 0x20a   : > { %1269 = vst [vmem:[#allocation2 + $0x30] sm:$0xff] %v1257_v55 }
 0x20b PF: > { %p2911_p5 = scmp.ne.s32.totalorder %s3672_s25, 1 }
 0x20c   : > { %v1275_v61 = vld [vmem:[#allocation2] sm:$0xff] (!%p2911_p5)  ;;  %v4086_v62 = vld [vmem:[#allocation2 + $0x8] sm:$0xff] (!%p2911_p5)  ;;  %v2912_v59 = vcombine.low (!%p2911_p5), %v3778_v0, %v3783_v1  ;;  %v4090_v46 = vld [vmem:[#allocation2 + $0x10] sm:$0xff] (!%p2911_p5)  ;;  %v3683_v51 = vmov (!%p2911_p5), 0   ;;  %v2913_v48 = vcombine.low (!%p2911_p5), %v3788_v2, %v3793_v3  ;;  %v2914_v47 = vcombine.low (!%p2911_p5), %v3798_v4, %v3803_v5 }
 0x20d   : > { %1274 = sbr.rel (%p2911_p5) target bundleno = 1023 (0x3ff), region = 76  ;;  %3209 = vmatprep.subr.bf16.mxu0 (!%p2911_p5), %v1275_v61  ;;  %3559 = vset.pattern.permute.xlu1 (!%p2911_p5), %v3683_v51  ;;  %v3560_v50 = vld [vmem:[%s4601_s7] sm:$0xff] (!%p2911_p5)   ;;  %v3561_v60 = vld [vmem:[%s4601_s7 + $0x8] sm:$0xff] (!%p2911_p5)   ;;  %v3562_v53 = vld [vmem:[%s4601_s7 + $0x10] sm:$0xff] (!%p2911_p5)   ;;  %v2915_v49 = vcombine.low (!%p2911_p5), %v3808_v6, %v3813_v7  ;;  %v2916_v42 = vcombine.low (!%p2911_p5), %v3818_v8, %v3823_v9  ;;  %v2917_v52 = vcombine.low (!%p2911_p5), %v3828_v10, %v3833_v11 }
 0x20e   : > { %3210 = vmatpush3.bf16.msra.mxu0 (!%p2911_p5), %v1275_v61  ;;  %3225 = vmatprep.mubr.bf16.mxu0 (!%p2911_p5), %v2912_v59  ;;  %v4106_v32 = vld [vmem:[#allocation2 + $0x18] sm:$0xff] (!%p2911_p5)  ;;  %v4115_v33 = vld [vmem:[#allocation2 + $0x20] sm:$0xff] (!%p2911_p5)  ;;  %v4124_v36 = vld [vmem:[#allocation2 + $0x28] sm:$0xff] (!%p2911_p5)  ;;  %v2918_v56 = vcombine.low (!%p2911_p5), %v3838_v12, %v3843_v13  ;;  %v2919_v58 = vcombine.low (!%p2911_p5), %v3848_v14, %v3853_v15 }
 0x20f   : > { %3211 = vmatprep.subr.bf16.mxu0 (!%p2911_p5), %v4086_v62  ;;  %3558 = vset.pattern.permute.xlu0 (!%p2911_p5), %v3683_v51  ;;  %v3563_v63 = vld [vmem:[%s4601_s7 + $0x18] sm:$0xff] (!%p2911_p5)   ;;  %v3564_v35 = vld [vmem:[%s4601_s7 + $0x20] sm:$0xff] (!%p2911_p5)   ;;  %v3566_v37 = vld [vmem:[%s4601_s7 + $0x28] sm:$0xff] (!%p2911_p5)  }
 0x210   : > { %1440 = vperm.xlu1 (!%p2911_p5), %3559, %v3868_v18   ;;  %1430 = vperm.xlu0 (!%p2911_p5), %3558, %v3858_v16   ;;  %v3568_v40 = vld [vmem:[%s4601_s7 + $0x30] sm:$0xff] (!%p2911_p5)   ;;  %v4142_v34 = vld [vmem:[#allocation2 + $0x38] sm:$0xff] (!%p2911_p5)  ;;  %v3565_v43 = vld [vmem:[%s4600_s6] sm:$0xff] (!%p2911_p5)  }
 0x211   : > { %3241 = vmatprep.subr.bf16.mxu1 (!%p2911_p5), %v3560_v50  ;;  %3257 = vmatprep.mubr.bf16.mxu1 (!%p2911_p5), %v1275_v61  ;;  %v4133_v39 = vld [vmem:[#allocation2 + $0x30] sm:$0xff] (!%p2911_p5)  ;;  %v3570_v38 = vld [vmem:[%s4601_s7 + $0x38] sm:$0xff] (!%p2911_p5)   ;;  %v3567_v44 = vld [vmem:[%s4600_s6 + $0x8] sm:$0xff] (!%p2911_p5)  }
 0x212   : > { %3212 = vmatpush3.bf16.msra.mxu0 (!%p2911_p5), %v4086_v62  ;;  %3242 = vmatpush3.bf16.msra.mxu1 (!%p2911_p5), %v3560_v50  ;;  %v3569_v41 = vld [vmem:[%s4600_s6 + $0x10] sm:$0xff] (!%p2911_p5)   ;;  %v3571_v54 = vld [vmem:[%s4600_s6 + $0x18] sm:$0xff] (!%p2911_p5)   ;;  %v3572_v45 = vld [vmem:[%s4600_s6 + $0x20] sm:$0xff] (!%p2911_p5)  }
 0x213   : > { %3213 = vmatprep.subr.bf16.mxu0 (!%p2911_p5), %v4090_v46  ;;  %3243 = vmatprep.subr.bf16.mxu1 (!%p2911_p5), %v3561_v60  ;;  %v3573_v57 = vld [vmem:[%s4600_s6 + $0x28] sm:$0xff] (!%p2911_p5)   ;;  %v3574_v55 = vld [vmem:[%s4600_s6 + $0x30] sm:$0xff] (!%p2911_p5)   ;;  %v3575_v61 = vld [vmem:[%s4600_s6 + $0x38] sm:$0xff] (!%p2911_p5)  }
 0x214   : > { %1445 = vperm.xlu1 %3559, %v3873_v19   ;;  %1435 = vperm.xlu0 %3558, %v3863_v17  }
 0x216   : > { %3214 = vmatpush3.bf16.msra.mxu0 %v4090_v46  ;;  %3244 = vmatpush3.bf16.msra.mxu1 %v3561_v60 }
 0x217   : > { %3215 = vmatprep.subr.bf16.mxu0 %v4106_v32  ;;  %3245 = vmatprep.subr.bf16.mxu1 %v3562_v53 }
 0x218   : > { %1475 = vperm.xlu1 %3559, %v3903_v25   ;;  %1470 = vperm.xlu0 %3558, %v3898_v24  }
 0x21a   : > { %3216 = vmatpush3.bf16.msra.mxu0 %v4106_v32  ;;  %3246 = vmatpush3.bf16.msra.mxu1 %v3562_v53 }
 0x21b   : > { %3217 = vmatprep.subr.bf16.mxu0 %v4115_v33  ;;  %3247 = vmatprep.subr.bf16.mxu1 %v3563_v63 }
 0x21c   : > { %1485 = vperm.xlu1 %3559, %v3913_v27   ;;  %1480 = vperm.xlu0 %3558, %v3908_v26  }
 0x21e   : > { %3218 = vmatpush3.bf16.msra.mxu0 %v4115_v33  ;;  %3248 = vmatpush3.bf16.msra.mxu1 %v3563_v63 }
 0x21f   : > { %3219 = vmatprep.subr.bf16.mxu0 %v4124_v36  ;;  %3249 = vmatprep.subr.bf16.mxu1 %v3564_v35 }
 0x220   : > { %1455 = vperm.xlu1 %3559, %v3883_v21   ;;  %1450 = vperm.xlu0 %3558, %v3878_v20  }
 0x222   : > { %3220 = vmatpush3.bf16.msra.mxu0 %v4124_v36  ;;  %3250 = vmatpush3.bf16.msra.mxu1 %v3564_v35 }
 0x223   : > { %3221 = vmatprep.subr.bf16.mxu0 %v4133_v39  ;;  %3251 = vmatprep.subr.bf16.mxu1 %v3566_v37 }
 0x224   : > { %1465 = vperm.xlu1 %3559, %v3893_v23   ;;  %1460 = vperm.xlu0 %3558, %v3888_v22  }
 0x226   : > { %3222 = vmatpush3.bf16.msra.mxu0 %v4133_v39  ;;  %3252 = vmatpush3.bf16.msra.mxu1 %v3566_v37 }
 0x227   : > { %3223 = vmatprep.subr.bf16.mxu0 %v4142_v34  ;;  %3253 = vmatprep.subr.bf16.mxu1 %v3568_v40 }
 0x228   : > { %1495 = vperm.xlu1 %3559, %v3923_v29   ;;  %1490 = vperm.xlu0 %3558, %v3918_v28  }
 0x22a   : > { %3224 = vmatpush3.bf16.msra.mxu0 %v4142_v34  ;;  %3254 = vmatpush3.bf16.msra.mxu1 %v3568_v40 }
 0x22b   : > { %3273 = vmatprep.subr.bf16.mxu0 %v3565_v43  ;;  %3255 = vmatprep.subr.bf16.mxu1 %v3570_v38 }
 0x22c   : > { %1505 = vperm.xlu1 %3559, %v3933_v31   ;;  %1500 = vperm.xlu0 %3558, %v3928_v30  }
 0x22d   : > { %3226 = vmatmul.mubr.bf16.vlgmr.msra.gmra.mrb[0].mxu0 %v2913_v48 }
 0x22e   : > { %3229 = vmatprep.mubr.bf16.mxu0 %v2914_v47  ;;  %3274 = vmatpush3.bf16.msra.mxu0 %v3565_v43 }
 0x22f   : > { %3275 = vmatprep.subr.bf16.mxu0 %v3567_v44  ;;  %3256 = vmatpush3.bf16.msra.mxu1 %v3570_v38 }
 0x230   : > { %3433 = vmatprep.subr.bf16.mxu1 %v3565_v43 }
 0x232   : > { %3276 = vmatpush3.bf16.msra.mxu0 %v3567_v44  ;;  %3258 = vmatmul.mubr.bf16.vlgmr.msra.gmra.mrb[0].mxu1 %v4086_v62 }
 0x233   : > { %3277 = vmatprep.subr.bf16.mxu0 %v3569_v41  ;;  %3441 = vmatpush3.bf16.msra.mxu1 %v3565_v43 }
 0x234   : > { %3434 = vmatprep.subr.bf16.mxu1 %v3567_v44  ;;  %3261 = vmatprep.mubr.bf16.mxu1 %v4090_v46 }
 0x235   : > { %3230 = vmatmul.mubr.bf16.gmra.mrb[4].mxu0 %v2915_v49 }
 0x236   : > { %3233 = vmatprep.mubr.bf16.mxu0 %v2916_v42  ;;  %3278 = vmatpush3.bf16.msra.mxu0 %v3569_v41 }
 0x237   : > { %3279 = vmatprep.subr.bf16.mxu0 %v3571_v54  ;;  %3442 = vmatpush3.bf16.msra.mxu1 %v3567_v44 }
 0x238   : > { %3435 = vmatprep.subr.bf16.mxu1 %v3569_v41 }
 0x23a   : > { %3280 = vmatpush3.bf16.msra.mxu0 %v3571_v54  ;;  %3262 = vmatmul.mubr.bf16.gmra.mrb[4].mxu1 %v4106_v32 }
 0x23b   : > { %3281 = vmatprep.subr.bf16.mxu0 %v3572_v45  ;;  %3443 = vmatpush3.bf16.msra.mxu1 %v3569_v41 }
 0x23c   : > { %3436 = vmatprep.subr.bf16.mxu1 %v3571_v54  ;;  %3265 = vmatprep.mubr.bf16.mxu1 %v4115_v33 }
 0x23d   : > { %3234 = vmatmul.mubr.bf16.gmra.mrb[8].mxu0 %v2917_v52 }
 0x23e   : > { %3237 = vmatprep.mubr.bf16.mxu0 %v2918_v56  ;;  %3282 = vmatpush3.bf16.msra.mxu0 %v3572_v45 }
 0x23f   : > { %3283 = vmatprep.subr.bf16.mxu0 %v3573_v57  ;;  %3444 = vmatpush3.bf16.msra.mxu1 %v3571_v54 }
 0x240   : > { %3437 = vmatprep.subr.bf16.mxu1 %v3572_v45 }
 0x242   : > { %3284 = vmatpush3.bf16.msra.mxu0 %v3573_v57  ;;  %3266 = vmatmul.mubr.bf16.gmra.mrb[8].mxu1 %v4124_v36 }
 0x243   : > { %3445 = vmatpush3.bf16.msra.mxu1 %v3572_v45  ;;  %3269 = vmatprep.mubr.bf16.mxu1 %v4133_v39 }
 0x244   : > { %3438 = vmatprep.subr.bf16.mxu1 %v3573_v57  ;;  %3285 = vmatprep.subr.bf16.mxu0 %v3574_v55 }
 0x245   : > { %3238 = vmatmul.mubr.bf16.gmra.mrb[12].mxu0 %v2919_v58 }
 0x246   : > { %3286 = vmatpush3.bf16.msra.mxu0 %v3574_v55 }
 0x247   : > { %3446 = vmatpush3.bf16.msra.mxu1 %v3573_v57  ;;  %3287 = vmatprep.subr.bf16.mxu0 %v3575_v61 }
 0x248   : > { %3439 = vmatprep.subr.bf16.mxu1 %v3574_v55 }
 0x24a   : > { %3270 = vmatmul.mubr.bf16.gmra.mrb[12].mxu1 %v4142_v34  ;;  %3288 = vmatpush3.bf16.msra.mxu0 %v3575_v61 }
 0x24b   : > { %3447 = vmatpush3.bf16.msra.mxu1 %v3574_v55 }
 0x24c   : > { %3440 = vmatprep.subr.bf16.mxu1 %v3575_v61 }
 0x24f   : > { %3448 = vmatpush3.bf16.msra.mxu1 %v3575_v61 }
 0x28f   : > { %v1441_v62 = vpop.permute.xlu1 %1440  ;;  %v1431_v59 = vpop.permute.xlu0 %1430 }
 0x293   : > { %v1446_v46 = vpop.permute.xlu1 %1445  ;;  %v1436_v51 = vpop.permute.xlu0 %1435 }
 0x297   : > { %v1476_v50 = vpop.permute.xlu1 %1475  ;;  %v1471_v60 = vpop.permute.xlu0 %1470 }
 0x29b   : > { %v1486_v53 = vpop.permute.xlu1 %1485  ;;  %v1481_v32 = vpop.permute.xlu0 %1480 }
 0x29f   : > { %v1456_v36 = vpop.permute.xlu1 %1455  ;;  %v1451_v34 = vpop.permute.xlu0 %1450 }
 0x2a3   : > { %v1466_v45 = vpop.permute.xlu1 %1465  ;;  %v1461_v56 = vpop.permute.xlu0 %1460 }
 0x300   : > { %v3227_v63 = vpop.f32.mrb[0].mxu0 }
 0x301   : > { %v1365_v33 = vpop.f32.mrb[1].mxu0  ;;  %v1510_v37 = vmul.f32 %v3227_v63, %v1441_v62 }
 0x302   : > { %v3228_v35 = vpop.f32.mrb[2].mxu0  ;;  %v1508_v43 = vmul.f32 %v1431_v59, %v1365_v33 }
 0x303   : > { %v1511_v39 = vmul.f32 %v3228_v35, %v1446_v46  ;;  %v1368_v40 = vpop.f32.mrb[3].mxu0 }
 0x304   : > { %v1509_v38 = vmul.f32 %v1436_v51, %v1368_v40 }
 0x305   : > { %v1525_v48 = vpack.c.bf16 %v1511_v39, %v1510_v37  ;;  %v3259_v47 = vpop.f32.mrb[0].mxu1 }
 0x306   : > { %v1524_v44 = vpack.c.bf16 %v1509_v38, %v1508_v43  ;;  %v1658_v41 = vpop.f32.mrb[1].mxu1  ;;  %v1496_v38 = vpop.permute.xlu1 %1495 }
 0x307   : > { %v3260_v49 = vpop.f32.mrb[2].mxu1 }
 0x308   : > { %v3231_v42 = vpop.f32.mrb[4].mxu0  ;;  %3289 = vmatprep.mubr.bf16.mxu0 %v1524_v44  ;;  %v1661_v54 = vpop.f32.mrb[3].mxu1 }
 0x309   : > { %v1381_v52 = vpop.f32.mrb[5].mxu0  ;;  %3290 = vmatmul.mubr.bf16.vlgmr.msra.gmra.mrb[16].mxu0 %v1525_v48  ;;  %v1514_v58 = vmul.f32 %v3231_v42, %v1461_v56 }
 0x30a   : > { %v3232_v57 = vpop.f32.mrb[6].mxu0  ;;  %v1512_v62 = vmul.f32 %v1451_v34, %v1381_v52 }
 0x30b   : > { %v1515_v55 = vmul.f32 %v3232_v57, %v1466_v45  ;;  %v1384_v61 = vpop.f32.mrb[7].mxu0  ;;  %v1491_v45 = vpop.permute.xlu0 %1490 }
 0x30c   : > { %v1513_v46 = vmul.f32 %v1456_v36, %v1384_v61 }
 0x30d   : > { %v1527_v59 = vpack.c.bf16 %v1515_v55, %v1514_v58  ;;  %v3263_v51 = vpop.f32.mrb[4].mxu1  ;;  %v1506_v58 = vpop.permute.xlu1 %1505 }
 0x30e   : > { %v1526_v63 = vpack.c.bf16 %v1513_v46, %v1512_v62  ;;  %v1674_v33 = vpop.f32.mrb[5].mxu1 }
 0x30f   : > { %v3264_v35 = vpop.f32.mrb[6].mxu1  ;;  %v1501_v61 = vpop.permute.xlu0 %1500 }
 0x310   : > { %v3235_v37 = vpop.f32.mrb[8].mxu0  ;;  %3293 = vmatprep.mubr.bf16.mxu0 %v1526_v63  ;;  %v4201_v39 = vpop.f32.mrb[7].mxu1 }
 0x311   : > { %v1397_v40 = vpop.f32.mrb[9].mxu0  ;;  %3294 = vmatmul.mubr.bf16.gmra.mrb[20].mxu0 %v1527_v59  ;;  %v1518_v48 = vmul.f32 %v3235_v37, %v1481_v32 }
 0x312   : > { %v3236_v43 = vpop.f32.mrb[10].mxu0  ;;  %v1516_v56 = vmul.f32 %v1471_v60, %v1397_v40 }
 0x313   : > { %v1519_v44 = vmul.f32 %v3236_v43, %v1486_v53  ;;  %v1400_v42 = vpop.f32.mrb[11].mxu0 }
 0x314   : > { %v1517_v34 = vmul.f32 %v1476_v50, %v1400_v42  ;;  %v4206_v50 = vld [vmem:[%s4602_s8] ss:$0 sm:$0xff] }
 0x315   : > { %v1529_v36 = vpack.c.bf16 %v1519_v44, %v1518_v48 }
 0x316   : > { %v1528_v52 = vpack.c.bf16 %v1517_v34, %v1516_v56 }
 0x318   : > { %v3239_v57 = vpop.f32.mrb[12].mxu0  ;;  %3297 = vmatprep.mubr.bf16.mxu1 %v1528_v52 }
 0x319   : > { %v1413_v55 = vpop.f32.mrb[13].mxu0  ;;  %3298 = vmatmul.mubr.bf16.vlgmr.msra.gmra.mrb[8].mxu1 %v1529_v36  ;;  %v1522_v46 = vmul.f32 %v3239_v57, %v1501_v61 }
 0x31a   : > { %v3240_v62 = vpop.f32.mrb[14].mxu0  ;;  %v1520_v14 = vmul.f32 %v1491_v45, %v1413_v55 }
 0x31b   : > { %v1523_v63 = vmul.f32 %v3240_v62, %v1506_v58  ;;  %v1416_v59 = vpop.f32.mrb[15].mxu0 }
 0x31c   : > { %v1521_v15 = vmul.f32 %v1496_v38, %v1416_v59 }
 0x31d   : > { %v1531_v32 = vpack.c.bf16 %v1523_v63, %v1522_v46 }
 0x31e   : > { %v1530_v53 = vpack.c.bf16 %v1521_v15, %v1520_v14 }
 0x320   : > { %3301 = vmatprep.mubr.bf16.mxu1 %v1530_v53 }
 0x321   : > { %3302 = vmatmul.mubr.bf16.gmra.mrb[12].mxu1 %v1531_v32 }
 0x3dc   : > { %v3291_v60 = vpop.f32.mrb[16].mxu0 }
 0x3dd   : > { %v1812_v37 = vadd.f32 %v3291_v60, %v3259_v47  ;;  %v1803_v40 = vpop.f32.mrb[17].mxu0 }
 0x3de   : > { %v1804_v43 = vadd.f32 %v1803_v40, %v1658_v41  ;;  %v3292_v48 = vpop.f32.mrb[18].mxu0 }
 0x3df   : > { %v1875_v44 = vadd.f32 %v4206_v50, %v1812_v37  ;;  %v1815_v42 = vadd.f32 %v3292_v48, %v3260_v49  ;;  %v1806_v56 = vpop.f32.mrb[19].mxu0 }
 0x3e0   : > { %v1873_v38 = vadd.f32 %v4206_v50, %v1804_v43  ;;  %v1807_v45 = vadd.f32 %v1806_v56, %v1661_v54 }
 0x3e1   : > { %v1891_v14 = vmax.f32 %v1875_v44, 0.0  ;;  %v1876_v15 = vadd.f32 %v4206_v50, %v1815_v42 }
 0x3e2   : > { %v1889_v34 = vmax.f32 %v1873_v38, 0.0  ;;  %v1874_v36 = vadd.f32 %v4206_v50, %v1807_v45 }
 0x3e3   : > { %1925 = vst [vmem:[%s4607_s13 + $0x10] sm:$0xff] %v1891_v14  ;;  %v1892_v47 = vmax.f32 %v1876_v15, 0.0 }
 0x3e4   : > { %1923 = vst [vmem:[%s4607_s13] sm:$0xff] %v1889_v34  ;;  %v1890_v41 = vmax.f32 %v1874_v36, 0.0  ;;  %v3295_v49 = vpop.f32.mrb[20].mxu0 }
 0x3e5   : > { %v1906_v52 = vpack.c.bf16 %v1892_v47, %v1891_v14  ;;  %1926 = vst [vmem:[%s4607_s13 + $0x18] sm:$0xff] %v1892_v47  ;;  %v1828_v54 = vadd.f32 %v3295_v49, %v3263_v51  ;;  %v1819_v57 = vpop.f32.mrb[21].mxu0 }
 0x3e6   : > { %v1905_v58 = vpack.c.bf16 %v1890_v41, %v1889_v34  ;;  %1924 = vst [vmem:[%s4607_s13 + $0x8] sm:$0xff] %v1890_v41  ;;  %v1820_v55 = vadd.f32 %v1819_v57, %v1674_v33  ;;  %v3296_v61 = vpop.f32.mrb[22].mxu0 }
 0x3e7   : > { %1916 = vst [vmem:[#allocation3 + $0x8] sm:$0xff] %v1906_v52  ;;  %v1879_v62 = vadd.f32 %v4206_v50, %v1828_v54  ;;  %v1831_v46 = vadd.f32 %v3296_v61, %v3264_v35  ;;  %v1822_v63 = vpop.f32.mrb[23].mxu0 }
 0x3e8   : > { %1915 = vst [vmem:[#allocation3] sm:$0xff] %v1905_v58  ;;  %v1877_v59 = vadd.f32 %v4206_v50, %v1820_v55  ;;  %v1823_v32 = vadd.f32 %v1822_v63, %v4201_v39 }
 0x3e9   : > { %v1895_v53 = vmax.f32 %v1879_v62, 0.0  ;;  %v1880_v51 = vadd.f32 %v4206_v50, %v1831_v46 }
 0x3ea   : > { %v1893_v60 = vmax.f32 %v1877_v59, 0.0  ;;  %v1878_v37 = vadd.f32 %v4206_v50, %v1823_v32 }
 0x3eb   : > { %1929 = vst [vmem:[%s4607_s13 + $0x30] sm:$0xff] %v1895_v53  ;;  %v1896_v33 = vmax.f32 %v1880_v51, 0.0 }
 0x3ec   : > { %1927 = vst [vmem:[%s4607_s13 + $0x20] sm:$0xff] %v1893_v60  ;;  %v1894_v35 = vmax.f32 %v1878_v37, 0.0  ;;  %v3299_v40 = vpop.f32.mrb[8].mxu1 }
 0x3ed   : > { %v1908_v43 = vpack.c.bf16 %v1896_v33, %v1895_v53  ;;  %1930 = vst [vmem:[%s4607_s13 + $0x38] sm:$0xff] %v1896_v33  ;;  %v1883_v39 = vadd.f32 %v3299_v40, %v4206_v50  ;;  %v1835_v48 = vpop.f32.mrb[9].mxu1 }
 0x3ee   : > { %v1907_v44 = vpack.c.bf16 %v1894_v35, %v1893_v60  ;;  %1928 = vst [vmem:[%s4607_s13 + $0x28] sm:$0xff] %v1894_v35  ;;  %v1881_v42 = vadd.f32 %v4206_v50, %v1835_v48  ;;  %v3300_v56 = vpop.f32.mrb[10].mxu1 }
 0x3ef   : > { %1918 = vst [vmem:[#allocation3 + $0x18] sm:$0xff] %v1908_v43  ;;  %v1899_v38 = vmax.f32 %v1883_v39, 0.0  ;;  %v1884_v45 = vadd.f32 %v3300_v56, %v4206_v50  ;;  %v1838_v14 = vpop.f32.mrb[11].mxu1 }
 0x3f0   : > { %1917 = vst [vmem:[#allocation3 + $0x10] sm:$0xff] %v1907_v44  ;;  %v1897_v15 = vmax.f32 %v1881_v42, 0.0  ;;  %v1882_v34 = vadd.f32 %v4206_v50, %v1838_v14 }
 0x3f1   : > { %1933 = vst [vmem:[%s4607_s13 + $0x50] sm:$0xff] %v1899_v38  ;;  %v1900_v36 = vmax.f32 %v1884_v45, 0.0 }
 0x3f2   : > { %1931 = vst [vmem:[%s4607_s13 + $0x40] sm:$0xff] %v1897_v15  ;;  %v1898_v47 = vmax.f32 %v1882_v34, 0.0 }
 0x3f3   : > { %v1910_v41 = vpack.c.bf16 %v1900_v36, %v1899_v38  ;;  %1934 = vst [vmem:[%s4607_s13 + $0x58] sm:$0xff] %v1900_v36 }
 0x3f4   : > { %v1909_v49 = vpack.c.bf16 %v1898_v47, %v1897_v15  ;;  %1932 = vst [vmem:[%s4607_s13 + $0x48] sm:$0xff] %v1898_v47  ;;  %v3303_v52 = vpop.f32.mrb[12].mxu1 }
 0x3f5   : > { %1920 = vst [vmem:[#allocation3 + $0x28] sm:$0xff] %v1910_v41  ;;  %v1887_v54 = vadd.f32 %v3303_v52, %v4206_v50  ;;  %v1851_v57 = vpop.f32.mrb[13].mxu1 }
 0x3f6   : > { %1919 = vst [vmem:[#allocation3 + $0x20] sm:$0xff] %v1909_v49  ;;  %v1885_v58 = vadd.f32 %v4206_v50, %v1851_v57  ;;  %v3304_v55 = vpop.f32.mrb[14].mxu1 }
 0x3f7   : > { %v1903_v61 = vmax.f32 %v1887_v54, 0.0  ;;  %v1888_v62 = vadd.f32 %v3304_v55, %v4206_v50  ;;  %v1854_v46 = vpop.f32.mrb[15].mxu1 }
 0x3f8   : > { %v1901_v63 = vmax.f32 %v1885_v58, 0.0  ;;  %v1886_v59 = vadd.f32 %v4206_v50, %v1854_v46 }
 0x3f9   : > { %1937 = vst [vmem:[%s4607_s13 + $0x70] sm:$0xff] %v1903_v61  ;;  %v1904_v32 = vmax.f32 %v1888_v62, 0.0 }
 0x3fa   : > { %1935 = vst [vmem:[%s4607_s13 + $0x60] sm:$0xff] %v1901_v63  ;;  %v1902_v53 = vmax.f32 %v1886_v59, 0.0 }
 0x3fb   : > { %v1912_v51 = vpack.c.bf16 %v1904_v32, %v1903_v61  ;;  %1938 = vst [vmem:[%s4607_s13 + $0x78] sm:$0xff] %v1904_v32 }
 0x3fc   : > { %v1911_v60 = vpack.c.bf16 %v1902_v53, %v1901_v63  ;;  %1936 = vst [vmem:[%s4607_s13 + $0x68] sm:$0xff] %v1902_v53 }
 0x3fd   : > { %1922 = vst [vmem:[#allocation3 + $0x38] sm:$0xff] %v1912_v51 }
 0x3fe   : > { %1921 = vst [vmem:[#allocation3 + $0x30] sm:$0xff] %v1911_v60 }
 0x3ff PF: > { %p2937_p6 = scmp.ne.s32.totalorder %s3672_s25, 2 }
 0x400   : > { %v1943_v50 = vld [vmem:[#allocation3] sm:$0xff] (!%p2937_p6)  ;;  %v4274_v37 = vld [vmem:[#allocation3 + $0x8] sm:$0xff] (!%p2937_p6)  ;;  %v2938_v33 = vcombine.low (!%p2937_p6), %v3778_v0, %v3783_v1  ;;  %v4278_v35 = vld [vmem:[#allocation3 + $0x10] sm:$0xff] (!%p2937_p6)  ;;  %v3684_v40 = vmov (!%p2937_p6), 0  }
 0x401   : > { %1942 = sbr.rel (%p2937_p6) target bundleno = 1847 (0x737), region = 80  ;;  %3305 = vmatprep.subr.bf16.mxu0 (!%p2937_p6), %v1943_v50  ;;  %3577 = vset.pattern.permute.xlu1 (!%p2937_p6), %v3684_v40  ;;  %v3578_v43 = vld [vmem:[%s4604_s10] sm:$0xff] (!%p2937_p6)   ;;  %v3579_v0 = vld [vmem:[%s4604_s10 + $0x8] sm:$0xff] (!%p2937_p6)   ;;  %v3580_v1 = vld [vmem:[%s4604_s10 + $0x10] sm:$0xff] (!%p2937_p6)  }
 0x402   : > { %3306 = vmatpush3.bf16.msra.mxu0 (!%p2937_p6), %v1943_v50  ;;  %3321 = vmatprep.mubr.bf16.mxu0 (!%p2937_p6), %v2938_v33  ;;  %v4294_v39 = vld [vmem:[#allocation3 + $0x18] sm:$0xff] (!%p2937_p6)  ;;  %v3584_v48 = vld [vmem:[%s4603_s9 + $0x8] sm:$0xff] (!%p2937_p6)  }
 0x403   : > { %3307 = vmatprep.subr.bf16.mxu0 (!%p2937_p6), %v4274_v37  ;;  %3576 = vset.pattern.permute.xlu0 (!%p2937_p6), %v3684_v40 }
 0x404   : > { %2108 = vperm.xlu1 (!%p2937_p6), %3577, %v3868_v18   ;;  %2098 = vperm.xlu0 (!%p2937_p6), %3576, %v3858_v16   ;;  %v3581_v16 = vld [vmem:[%s4604_s10 + $0x18] sm:$0xff] (!%p2937_p6)   ;;  %v4303_v18 = vld [vmem:[#allocation3 + $0x20] sm:$0xff] (!%p2937_p6) }
 0x405   : > { %3337 = vmatprep.subr.bf16.mxu1 (!%p2937_p6), %v3578_v43  ;;  %3353 = vmatprep.mubr.bf16.mxu1 (!%p2937_p6), %v1943_v50 }
 0x406   : > { %3308 = vmatpush3.bf16.msra.mxu0 (!%p2937_p6), %v4274_v37  ;;  %3338 = vmatpush3.bf16.msra.mxu1 (!%p2937_p6), %v3578_v43 }
 0x407   : > { %3309 = vmatprep.subr.bf16.mxu0 (!%p2937_p6), %v4278_v35  ;;  %3339 = vmatprep.subr.bf16.mxu1 (!%p2937_p6), %v3579_v0 }
 0x408   : > { %2113 = vperm.xlu1 %3577, %v3873_v19   ;;  %2103 = vperm.xlu0 %3576, %v3863_v17   ;;  %v3583_v17 = vld [vmem:[%s4604_s10 + $0x20] sm:$0xff]   ;;  %v4312_v19 = vld [vmem:[#allocation3 + $0x28] sm:$0xff] }
 0x40a   : > { %3310 = vmatpush3.bf16.msra.mxu0 %v4278_v35  ;;  %3340 = vmatpush3.bf16.msra.mxu1 %v3579_v0 }
 0x40b   : > { %3311 = vmatprep.subr.bf16.mxu0 %v4294_v39  ;;  %3341 = vmatprep.subr.bf16.mxu1 %v3580_v1 }
 0x40c   : > { %2143 = vperm.xlu1 %3577, %v3903_v25   ;;  %2138 = vperm.xlu0 %3576, %v3898_v24   ;;  %v3585_v24 = vld [vmem:[%s4604_s10 + $0x28] sm:$0xff]   ;;  %v4321_v25 = vld [vmem:[#allocation3 + $0x30] sm:$0xff] }
 0x40e   : > { %3312 = vmatpush3.bf16.msra.mxu0 %v4294_v39  ;;  %3342 = vmatpush3.bf16.msra.mxu1 %v3580_v1 }
 0x40f   : > { %3313 = vmatprep.subr.bf16.mxu0 %v4303_v18  ;;  %3343 = vmatprep.subr.bf16.mxu1 %v3581_v16 }
 0x410   : > { %2153 = vperm.xlu1 %3577, %v3913_v27   ;;  %2148 = vperm.xlu0 %3576, %v3908_v26   ;;  %v3587_v26 = vld [vmem:[%s4604_s10 + $0x30] sm:$0xff]   ;;  %v4330_v27 = vld [vmem:[#allocation3 + $0x38] sm:$0xff] }
 0x412   : > { %3314 = vmatpush3.bf16.msra.mxu0 %v4303_v18  ;;  %3344 = vmatpush3.bf16.msra.mxu1 %v3581_v16 }
 0x413   : > { %3315 = vmatprep.subr.bf16.mxu0 %v4312_v19  ;;  %3345 = vmatprep.subr.bf16.mxu1 %v3583_v17 }
 0x414   : > { %2123 = vperm.xlu1 %3577, %v3883_v21   ;;  %2118 = vperm.xlu0 %3576, %v3878_v20   ;;  %v3582_v20 = vld [vmem:[%s4603_s9] sm:$0xff]   ;;  %v3589_v21 = vld [vmem:[%s4604_s10 + $0x38] sm:$0xff]  }
 0x416   : > { %3316 = vmatpush3.bf16.msra.mxu0 %v4312_v19  ;;  %3346 = vmatpush3.bf16.msra.mxu1 %v3583_v17 }
 0x417   : > { %3317 = vmatprep.subr.bf16.mxu0 %v4321_v25  ;;  %3347 = vmatprep.subr.bf16.mxu1 %v3585_v24 }
 0x418   : > { %2133 = vperm.xlu1 %3577, %v3893_v23   ;;  %2128 = vperm.xlu0 %3576, %v3888_v22   ;;  %v2939_v23 = vcombine.low %v3788_v2, %v3793_v3  ;;  %v2940_v22 = vcombine.low %v3798_v4, %v3803_v5  ;;  %v3586_v2 = vld [vmem:[%s4603_s9 + $0x10] sm:$0xff]   ;;  %v2941_v3 = vcombine.low %v3808_v6, %v3813_v7  ;;  %v3588_v5 = vld [vmem:[%s4603_s9 + $0x18] sm:$0xff]   ;;  %v3590_v6 = vld [vmem:[%s4603_s9 + $0x20] sm:$0xff]  }
 0x419   : > { %v2942_v4 = vcombine.low %v3818_v8, %v3823_v9  ;;  %v2943_v7 = vcombine.low %v3828_v10, %v3833_v11  ;;  %v2944_v8 = vcombine.low %v3838_v12, %v3843_v13  ;;  %v3591_v9 = vld [vmem:[%s4603_s9 + $0x28] sm:$0xff]   ;;  %v4613_v11 = vld [vmem:[#allocation4_spill] sm:$0xff]  ;;  %v3592_v13 = vld [vmem:[%s4603_s9 + $0x30] sm:$0xff]  }
 0x41a   : > { %3318 = vmatpush3.bf16.msra.mxu0 %v4321_v25  ;;  %3348 = vmatpush3.bf16.msra.mxu1 %v3585_v24  ;;  %v4612_v10 = vld [vmem:[#allocation5_spill] sm:$0xff] }
 0x41b   : > { %3319 = vmatprep.subr.bf16.mxu0 %v4330_v27  ;;  %3349 = vmatprep.subr.bf16.mxu1 %v3587_v26  ;;  %v2945_v12 = vcombine.low %v4613_v11, %v4612_v10 }
 0x41c   : > { %2163 = vperm.xlu1 %3577, %v3923_v29   ;;  %2158 = vperm.xlu0 %3576, %v3918_v28   ;;  %v3593_v28 = vld [vmem:[%s4603_s9 + $0x38] sm:$0xff]  }
 0x41e   : > { %3320 = vmatpush3.bf16.msra.mxu0 %v4330_v27  ;;  %3350 = vmatpush3.bf16.msra.mxu1 %v3587_v26 }
 0x41f   : > { %3369 = vmatprep.subr.bf16.mxu0 %v3582_v20  ;;  %3351 = vmatprep.subr.bf16.mxu1 %v3589_v21 }
 0x420   : > { %2173 = vperm.xlu1 %3577, %v3933_v31   ;;  %2168 = vperm.xlu0 %3576, %v3928_v30  }
 0x421   : > { %3322 = vmatmul.mubr.bf16.vlgmr.msra.gmra.mrb[0].mxu0 %v2939_v23 }
 0x422   : > { %3325 = vmatprep.mubr.bf16.mxu0 %v2940_v22  ;;  %3370 = vmatpush3.bf16.msra.mxu0 %v3582_v20 }
 0x423   : > { %3371 = vmatprep.subr.bf16.mxu0 %v3584_v48  ;;  %3352 = vmatpush3.bf16.msra.mxu1 %v3589_v21 }
 0x424   : > { %3465 = vmatprep.subr.bf16.mxu1 %v3582_v20 }
 0x426   : > { %3372 = vmatpush3.bf16.msra.mxu0 %v3584_v48  ;;  %3354 = vmatmul.mubr.bf16.vlgmr.msra.gmra.mrb[0].mxu1 %v4274_v37 }
 0x427   : > { %3373 = vmatprep.subr.bf16.mxu0 %v3586_v2  ;;  %3473 = vmatpush3.bf16.msra.mxu1 %v3582_v20 }
 0x428   : > { %3466 = vmatprep.subr.bf16.mxu1 %v3584_v48  ;;  %3357 = vmatprep.mubr.bf16.mxu1 %v4278_v35 }
 0x429   : > { %3326 = vmatmul.mubr.bf16.gmra.mrb[4].mxu0 %v2941_v3 }
 0x42a   : > { %3329 = vmatprep.mubr.bf16.mxu0 %v2942_v4  ;;  %3374 = vmatpush3.bf16.msra.mxu0 %v3586_v2 }
 0x42b   : > { %3375 = vmatprep.subr.bf16.mxu0 %v3588_v5  ;;  %3474 = vmatpush3.bf16.msra.mxu1 %v3584_v48 }
 0x42c   : > { %3467 = vmatprep.subr.bf16.mxu1 %v3586_v2 }
 0x42e   : > { %3376 = vmatpush3.bf16.msra.mxu0 %v3588_v5  ;;  %3358 = vmatmul.mubr.bf16.gmra.mrb[4].mxu1 %v4294_v39 }
 0x42f   : > { %3377 = vmatprep.subr.bf16.mxu0 %v3590_v6  ;;  %3475 = vmatpush3.bf16.msra.mxu1 %v3586_v2 }
 0x430   : > { %3468 = vmatprep.subr.bf16.mxu1 %v3588_v5  ;;  %3361 = vmatprep.mubr.bf16.mxu1 %v4303_v18 }
 0x431   : > { %3330 = vmatmul.mubr.bf16.gmra.mrb[8].mxu0 %v2943_v7 }
 0x432   : > { %3333 = vmatprep.mubr.bf16.mxu0 %v2944_v8  ;;  %3378 = vmatpush3.bf16.msra.mxu0 %v3590_v6 }
 0x433   : > { %3379 = vmatprep.subr.bf16.mxu0 %v3591_v9  ;;  %3476 = vmatpush3.bf16.msra.mxu1 %v3588_v5 }
 0x434   : > { %3469 = vmatprep.subr.bf16.mxu1 %v3590_v6 }
 0x436   : > { %3380 = vmatpush3.bf16.msra.mxu0 %v3591_v9  ;;  %3362 = vmatmul.mubr.bf16.gmra.mrb[8].mxu1 %v4312_v19 }
 0x437   : > { %3477 = vmatpush3.bf16.msra.mxu1 %v3590_v6  ;;  %3365 = vmatprep.mubr.bf16.mxu1 %v4321_v25 }
 0x438   : > { %3470 = vmatprep.subr.bf16.mxu1 %v3591_v9  ;;  %3381 = vmatprep.subr.bf16.mxu0 %v3592_v13 }
 0x439   : > { %3334 = vmatmul.mubr.bf16.gmra.mrb[12].mxu0 %v2945_v12 }
 0x43a   : > { %3382 = vmatpush3.bf16.msra.mxu0 %v3592_v13 }
 0x43b   : > { %3478 = vmatpush3.bf16.msra.mxu1 %v3591_v9  ;;  %3383 = vmatprep.subr.bf16.mxu0 %v3593_v28 }
 0x43c   : > { %3471 = vmatprep.subr.bf16.mxu1 %v3592_v13 }
 0x43e   : > { %3366 = vmatmul.mubr.bf16.gmra.mrb[12].mxu1 %v4330_v27  ;;  %3384 = vmatpush3.bf16.msra.mxu0 %v3593_v28 }
 0x43f   : > { %3479 = vmatpush3.bf16.msra.mxu1 %v3592_v13 }
 0x440   : > { %3472 = vmatprep.subr.bf16.mxu1 %v3593_v28 }
 0x443   : > { %3480 = vmatpush3.bf16.msra.mxu1 %v3593_v28 }
 0x483   : > { %v2109_v29 = vpop.permute.xlu1 %2108  ;;  %v2099_v30 = vpop.permute.xlu0 %2098 }
 0x487   : > { %v2114_v31 = vpop.permute.xlu1 %2113  ;;  %v2104_v44 = vpop.permute.xlu0 %2103 }
 0x48b   : > { %v2144_v42 = vpop.permute.xlu1 %2143  ;;  %v2139_v56 = vpop.permute.xlu0 %2138 }
 0x48f   : > { %v2154_v38 = vpop.permute.xlu1 %2153  ;;  %v2149_v45 = vpop.permute.xlu0 %2148 }
 0x493   : > { %v2124_v36 = vpop.permute.xlu1 %2123  ;;  %v2119_v52 = vpop.permute.xlu0 %2118 }
 0x497   : > { %v2134_v32 = vpop.permute.xlu1 %2133  ;;  %v2129_v51 = vpop.permute.xlu0 %2128 }
 0x49b   : > { %v2164_v25 = vpop.permute.xlu1 %2163  ;;  %v2159_v21 = vpop.permute.xlu0 %2158 }
 0x49f   : > { %v2174_v4 = vpop.permute.xlu1 %2173  ;;  %v2169_v6 = vpop.permute.xlu0 %2168 }
 0x4f4   : > { %v3323_v14 = vpop.f32.mrb[0].mxu0 }
 0x4f5   : > { %v2033_v15 = vpop.f32.mrb[1].mxu0  ;;  %v2178_v47 = vmul.f32 %v3323_v14, %v2109_v29  ;;  %v2557_v29 = vlaneseq }
 0x4f6   : > { %v3324_v34 = vpop.f32.mrb[2].mxu0  ;;  %v2176_v54 = vmul.f32 %v2099_v30, %v2033_v15 }
 0x4f7   : > { %v2179_v41 = vmul.f32 %v3324_v34, %v2114_v31  ;;  %v2036_v49 = vpop.f32.mrb[3].mxu0  ;;  %v4389_v30 = vand.u32 127, %v2557_v29 }
 0x4f8   : > { %v2177_v57 = vmul.f32 %v2104_v44, %v2036_v49  ;;  %v4394_v44 = vld [vmem:[%s4605_s11] ss:$0 sm:$0xff] }
 0x4f9   : > { %v2193_v58 = vpack.c.bf16 %v2179_v41, %v2178_v47  ;;  %v3355_v55 = vpop.f32.mrb[0].mxu1  ;;  %vm2559_vm0 = vcmp.lt.s32.totalorder %v4389_v30, 8 }
 0x4fa   : > { %v2192_v61 = vpack.c.bf16 %v2177_v57, %v2176_v54  ;;  %v2326_v62 = vpop.f32.mrb[1].mxu1 }
 0x4fb   : > { %v3356_v46 = vpop.f32.mrb[2].mxu1 }
 0x4fc   : > { %v3327_v63 = vpop.f32.mrb[4].mxu0  ;;  %3385 = vmatprep.mubr.bf16.mxu0 %v2192_v61  ;;  %v2329_v59 = vpop.f32.mrb[3].mxu1 }
 0x4fd   : > { %v2049_v53 = vpop.f32.mrb[5].mxu0  ;;  %3386 = vmatmul.mubr.bf16.vlgmr.msra.gmra.mrb[16].mxu0 %v2193_v58  ;;  %v2182_v50 = vmul.f32 %v3327_v63, %v2129_v51 }
 0x4fe   : > { %v3328_v60 = vpop.f32.mrb[6].mxu0  ;;  %v2180_v35 = vmul.f32 %v2119_v52, %v2049_v53 }
 0x4ff   : > { %v2183_v37 = vmul.f32 %v3328_v60, %v2134_v32  ;;  %v2052_v33 = vpop.f32.mrb[7].mxu0 }
 0x500   : > { %v2181_v40 = vmul.f32 %v2124_v36, %v2052_v33 }
 0x501   : > { %v2195_v43 = vpack.c.bf16 %v2183_v37, %v2182_v50  ;;  %v3359_v0 = vpop.f32.mrb[4].mxu1 }
 0x502   : > { %v2194_v1 = vpack.c.bf16 %v2181_v40, %v2180_v35  ;;  %v2342_v39 = vpop.f32.mrb[5].mxu1 }
 0x503   : > { %v3360_v16 = vpop.f32.mrb[6].mxu1 }
 0x504   : > { %v3331_v18 = vpop.f32.mrb[8].mxu0  ;;  %3389 = vmatprep.mubr.bf16.mxu0 %v2194_v1  ;;  %v2345_v17 = vpop.f32.mrb[7].mxu1 }
 0x505   : > { %v2065_v19 = vpop.f32.mrb[9].mxu0  ;;  %3390 = vmatmul.mubr.bf16.gmra.mrb[20].mxu0 %v2195_v43  ;;  %v2186_v26 = vmul.f32 %v3331_v18, %v2149_v45 }
 0x506   : > { %v3332_v24 = vpop.f32.mrb[10].mxu0  ;;  %v2184_v23 = vmul.f32 %v2139_v56, %v2065_v19 }
 0x507   : > { %v2187_v27 = vmul.f32 %v3332_v24, %v2154_v38  ;;  %v2068_v20 = vpop.f32.mrb[11].mxu0 }
 0x508   : > { %v2185_v22 = vmul.f32 %v2144_v42, %v2068_v20 }
 0x509   : > { %v2197_v48 = vpack.c.bf16 %v2187_v27, %v2186_v26 }
 0x50a   : > { %v2196_v2 = vpack.c.bf16 %v2185_v22, %v2184_v23 }
 0x50c   : > { %v3335_v3 = vpop.f32.mrb[12].mxu0  ;;  %3393 = vmatprep.mubr.bf16.mxu1 %v2196_v2 }
 0x50d   : > { %v2081_v5 = vpop.f32.mrb[13].mxu0  ;;  %3394 = vmatmul.mubr.bf16.vlgmr.msra.gmra.mrb[8].mxu1 %v2197_v48  ;;  %v2190_v8 = vmul.f32 %v3335_v3, %v2169_v6 }
 0x50e   : > { %v3336_v7 = vpop.f32.mrb[14].mxu0  ;;  %v2188_v11 = vmul.f32 %v2159_v21, %v2081_v5 }
 0x50f   : > { %v2191_v9 = vmul.f32 %v3336_v7, %v2174_v4  ;;  %v2084_v10 = vpop.f32.mrb[15].mxu0 }
 0x510   : > { %v2189_v12 = vmul.f32 %v2164_v25, %v2084_v10 }
 0x511   : > { %v2199_v13 = vpack.c.bf16 %v2191_v9, %v2190_v8 }
 0x512   : > { %v2198_v28 = vpack.c.bf16 %v2189_v12, %v2188_v11 }
 0x514   : > { %3397 = vmatprep.mubr.bf16.mxu1 %v2198_v28 }
 0x515   : > { %3398 = vmatmul.mubr.bf16.gmra.mrb[12].mxu1 %v2199_v13 }
 0x5d0   : > { %v3387_v31 = vpop.f32.mrb[16].mxu0 }
 0x5d1   : > { %v2480_v42 = vadd.f32 %v3387_v31, %v3355_v55  ;;  %v2471_v56 = vpop.f32.mrb[17].mxu0 }
 0x5d2   : > { %v2472_v38 = vadd.f32 %v2471_v56, %v2326_v62  ;;  %v3388_v45 = vpop.f32.mrb[18].mxu0 }
 0x5d3   : > { %v2483_v14 = vadd.f32 %v3388_v45, %v3356_v46  ;;  %v2474_v15 = vpop.f32.mrb[19].mxu0  ;;  %v2543_v34 = vadd.f32 %v4394_v44, %v2480_v42 }
 0x5d4   : > { %v2475_v36 = vadd.f32 %v2474_v15, %v2329_v59  ;;  %v2541_v41 = vadd.f32 %v4394_v44, %v2472_v38 }
 0x5d5   : > { %v4400_v47 = vsel %vm2559_vm0, %v2543_v34, -1e+30  ;;  %v2544_v61 = vadd.f32 %v4394_v44, %v2483_v14 }
 0x5d6   : > { %2580 = vmax.xlane.f32.xlu0 %v4400_v47  ;;  %v2542_v49 = vadd.f32 %v4394_v44, %v2475_v36  ;;  %v2560_v55 = vsel %vm2559_vm0, %v2541_v41, -1e+30 }
 0x5d7   : > { %v2563_v60 = vsel %vm2559_vm0, %v2544_v61, -1e+30 }
 0x5d8   : > { %v3391_v52 = vpop.f32.mrb[20].mxu0  ;;  %v4407_v54 = vsel %vm2559_vm0, %v2542_v49, -1e+30 }
 0x5d9   : > { %v2496_v57 = vadd.f32 %v3391_v52, %v3359_v0  ;;  %v2487_v58 = vpop.f32.mrb[21].mxu0  ;;  %2578 = vmax.xlane.f32.xlu1 %v4407_v54 }
 0x5da   : > { %v2488_v62 = vadd.f32 %v2487_v58, %v2342_v39  ;;  %v3392_v46 = vpop.f32.mrb[22].mxu0  ;;  %2576 = vmax.xlane.f32.xlu0 %v2560_v55 }
 0x5db   : > { %v2499_v63 = vadd.f32 %v3392_v46, %v3360_v16  ;;  %v2490_v59 = vpop.f32.mrb[23].mxu0  ;;  %v2547_v32 = vadd.f32 %v4394_v44, %v2496_v57 }
 0x5dc   : > { %v2491_v53 = vadd.f32 %v2490_v59, %v2345_v17  ;;  %v2545_v50 = vadd.f32 %v4394_v44, %v2488_v62 }
 0x5dd   : > { %v2566_v51 = vsel %vm2559_vm0, %v2547_v32, -1e+30  ;;  %v2548_v37 = vadd.f32 %v4394_v44, %v2499_v63 }
 0x5de   : > { %2588 = vmax.xlane.f32.xlu1 %v2566_v51  ;;  %2582 = vmax.xlane.f32.xlu0 %v2563_v60  ;;  %v2564_v43 = vsel %vm2559_vm0, %v2545_v50, -1e+30  ;;  %v2546_v1 = vadd.f32 %v4394_v44, %v2491_v53 }
 0x5df   : > { %v2567_v0 = vsel %vm2559_vm0, %v2548_v37, -1e+30 }
 0x5e0   : > { %v3395_v33 = vpop.f32.mrb[8].mxu1  ;;  %v2565_v24 = vsel %vm2559_vm0, %v2546_v1, -1e+30 }
 0x5e1   : > { %v2551_v35 = vadd.f32 %v3395_v33, %v4394_v44  ;;  %v2503_v40 = vpop.f32.mrb[9].mxu1 }
 0x5e2   : > { %v3396_v39 = vpop.f32.mrb[10].mxu1  ;;  %2584 = vmax.xlane.f32.xlu1 %v2564_v43  ;;  %2590 = vmax.xlane.f32.xlu0 %v2567_v0  ;;  %v2549_v18 = vadd.f32 %v4394_v44, %v2503_v40 }
 0x5e3   : > { %v2506_v16 = vpop.f32.mrb[11].mxu1  ;;  %v2552_v17 = vadd.f32 %v3396_v39, %v4394_v44  ;;  %v2570_v19 = vsel %vm2559_vm0, %v2551_v35, -1e+30 }
 0x5e4   : > { %v2550_v26 = vadd.f32 %v4394_v44, %v2506_v16  ;;  %v2568_v20 = vsel %vm2559_vm0, %v2549_v18, -1e+30 }
 0x5e5   : > { %v2571_v21 = vsel %vm2559_vm0, %v2552_v17, -1e+30 }
 0x5e6   : > { %2596 = vmax.xlane.f32.xlu1 %v2570_v19  ;;  %2586 = vmax.xlane.f32.xlu0 %v2565_v24  ;;  %v4446_v5 = vsel %vm2559_vm0, %v2550_v26, -1e+30 }
 0x5e8   : > { %v3399_v25 = vpop.f32.mrb[12].mxu1 }
 0x5e9   : > { %v2519_v27 = vpop.f32.mrb[13].mxu1  ;;  %v2555_v3 = vadd.f32 %v3399_v25, %v4394_v44 }
 0x5ea   : > { %v2553_v23 = vadd.f32 %v4394_v44, %v2519_v27  ;;  %2592 = vmax.xlane.f32.xlu1 %v2568_v20  ;;  %2598 = vmax.xlane.f32.xlu0 %v2571_v21  ;;  %v3400_v22 = vpop.f32.mrb[14].mxu1 }
 0x5eb   : > { %v2522_v48 = vpop.f32.mrb[15].mxu1  ;;  %v2556_v6 = vadd.f32 %v3400_v22, %v4394_v44  ;;  %v4453_v7 = vsel %vm2559_vm0, %v2555_v3, -1e+30 }
 0x5ec   : > { %v4440_v2 = vsel %vm2559_vm0, %v2553_v23, -1e+30  ;;  %v2554_v4 = vadd.f32 %v4394_v44, %v2522_v48 }
 0x5ed   : > { %v4463_v9 = vsel %vm2559_vm0, %v2556_v6, -1e+30 }
 0x5ee   : > { %2594 = vmax.xlane.f32.xlu0 %v4446_v5  ;;  %2600 = vmax.xlane.f32.xlu1 %v4440_v2  ;;  %v4457_v8 = vsel %vm2559_vm0, %v2554_v4, -1e+30 }
 0x5f2   : > { %2604 = vmax.xlane.f32.xlu1 %v4453_v7  ;;  %2602 = vmax.xlane.f32.xlu0 %v4457_v8 }
 0x5f6   : > { %2606 = vmax.xlane.f32.xlu0 %v4463_v9 }
 0x663   : > { %v2581_v10 = vpop.xlane.xlu0 %2580 }
 0x664   : > { %v4467_v11 = vsub.f32 %v4400_v47, %v2581_v10 }
 0x666   : > { %v2628_v12 = vmul.f32 1.442695, %v4467_v11  ;;  %v2579_v13 = vpop.xlane.xlu1 %2578 }
 0x667   : > { %v2577_v28 = vpop.xlane.xlu0 %2576  ;;  %v4478_v38 = vsub.f32 %v4407_v54, %v2579_v13 }
 0x668   : > { %3594 = vpow2.f32 %v2628_v12  ;;  %v4470_v29 = vsub.f32 %v2560_v55, %v2577_v28 }
 0x669   : > { %v2626_v47 = vmul.f32 1.442695, %v4478_v38 }
 0x66a   : > { %v2624_v31 = vmul.f32 1.442695, %v4470_v29 }
 0x66b   : > { %v2589_v44 = vpop.xlane.xlu1 %2588  ;;  %v2583_v42 = vpop.xlane.xlu0 %2582 }
 0x66c   : > { %3596 = vpow2.f32 %v2624_v31  ;;  %v4473_v30 = vsub.f32 %v2566_v51, %v2589_v44  ;;  %v4475_v56 = vsub.f32 %v2563_v60, %v2583_v42 }
 0x66e   : > { %v2636_v45 = vmul.f32 1.442695, %v4473_v30  ;;  %v2630_v14 = vmul.f32 1.442695, %v4475_v56 }
 0x66f   : > { %v2585_v15 = vpop.xlane.xlu1 %2584  ;;  %v2591_v34 = vpop.xlane.xlu0 %2590 }
 0x670   : > { %3598 = vpow2.f32 %v2636_v45  ;;  %v4482_v36 = vsub.f32 %v2564_v43, %v2585_v15  ;;  %v4485_v41 = vsub.f32 %v2567_v0, %v2591_v34 }
 0x671   : > { %3600 = vpow2.f32 %v2630_v14 }
 0x672   : > { %v3595_v49 = vpop.eup %3594  ;;  %v2632_v52 = vmul.f32 1.442695, %v4482_v36  ;;  %v2638_v55 = vmul.f32 1.442695, %v4485_v41 }
 0x673   : > { %v2597_v57 = vpop.xlane.xlu1 %2596  ;;  %v2587_v54 = vpop.xlane.xlu0 %2586  ;;  %2660 = vadd.xlane.f32.xlu1 %v3595_v49 }
 0x674   : > { %3602 = vpow2.f32 %v2632_v52  ;;  %v4488_v58 = vsub.f32 %v2570_v19, %v2597_v57  ;;  %v4491_v61 = vsub.f32 %v2565_v24, %v2587_v54 }
 0x675   : > { %3604 = vpow2.f32 %v2626_v47 }
 0x676   : > { %v3597_v62 = vpop.eup %3596  ;;  %v2644_v46 = vmul.f32 1.442695, %v4488_v58  ;;  %v2634_v51 = vmul.f32 1.442695, %v4491_v61 }
 0x677   : > { %v2593_v63 = vpop.xlane.xlu1 %2592  ;;  %v2599_v59 = vpop.xlane.xlu0 %2598  ;;  %2656 = vadd.xlane.f32.xlu1 %v3597_v62 }
 0x678   : > { %3606 = vpow2.f32 %v2644_v46  ;;  %v4494_v32 = vsub.f32 %v2568_v20, %v2593_v63  ;;  %v4496_v53 = vsub.f32 %v2571_v21, %v2599_v59 }
 0x679   : > { %3608 = vpow2.f32 %v2638_v55 }
 0x67a   : > { %v3599_v60 = vpop.eup %3598  ;;  %v2640_v50 = vmul.f32 1.442695, %v4494_v32  ;;  %v2646_v40 = vmul.f32 1.442695, %v4496_v53 }
 0x67b   : > { %v3601_v37 = vpop.eup %3600  ;;  %v2595_v33 = vpop.xlane.xlu0 %2594  ;;  %2668 = vadd.xlane.f32.xlu1 %v3599_v60 }
 0x67c   : > { %v2601_v35 = vpop.xlane.xlu1 %2600  ;;  %3610 = vpow2.f32 %v2640_v50  ;;  %2662 = vadd.xlane.f32.xlu0 %v3601_v37  ;;  %v4505_v0 = vsub.f32 %v4446_v5, %v2595_v33 }
 0x67d   : > { %v4502_v43 = vsub.f32 %v4440_v2, %v2601_v35  ;;  %3612 = vpow2.f32 %v2634_v51 }
 0x67e   : > { %v3603_v1 = vpop.eup %3602  ;;  %3614 = vpow2.f32 %v2646_v40  ;;  %v2642_v24 = vmul.f32 1.442695, %v4505_v0 }
 0x67f   : > { %v2648_v39 = vmul.f32 1.442695, %v4502_v43  ;;  %v3605_v16 = vpop.eup %3604  ;;  %2664 = vadd.xlane.f32.xlu1 %v3603_v1  ;;  %v2603_v17 = vpop.xlane.xlu0 %2602 }
 0x680   : > { %v2605_v18 = vpop.xlane.xlu1 %2604  ;;  %2658 = vadd.xlane.f32.xlu0 %v3605_v16  ;;  %v4513_v25 = vsub.f32 %v4457_v8, %v2603_v17 }
 0x681   : > { %v4509_v19 = vsub.f32 %v4453_v7, %v2605_v18  ;;  %3616 = vpow2.f32 %v2648_v39 }
 0x682   : > { %v3607_v26 = vpop.eup %3606  ;;  %v2650_v23 = vmul.f32 1.442695, %v4513_v25 }
 0x683   : > { %v2652_v27 = vmul.f32 1.442695, %v4509_v19  ;;  %v3609_v20 = vpop.eup %3608  ;;  %2676 = vadd.xlane.f32.xlu1 %v3607_v26  ;;  %v2607_v21 = vpop.xlane.xlu0 %2606 }
 0x684   : > { %2670 = vadd.xlane.f32.xlu0 %v3609_v20  ;;  %v4518_v22 = vsub.f32 %v4463_v9, %v2607_v21 }
 0x685   : > { %3618 = vpow2.f32 %v2652_v27 }
 0x686   : > { %3620 = vpow2.f32 %v2642_v24  ;;  %v3611_v48 = vpop.eup %3610  ;;  %v2654_v3 = vmul.f32 1.442695, %v4518_v22 }
 0x687   : > { %v3613_v2 = vpop.eup %3612  ;;  %2672 = vadd.xlane.f32.xlu1 %v3611_v48  ;;  %3622 = vpow2.f32 %v2650_v23 }
 0x688   : > { %2666 = vadd.xlane.f32.xlu0 %v3613_v2  ;;  %v3615_v4 = vpop.eup %3614  ;;  %3624 = vpow2.f32 %v2654_v3 }
 0x68b   : > { %v3617_v5 = vpop.eup %3616 }
 0x68c   : > { %2680 = vadd.xlane.f32.xlu1 %v3617_v5  ;;  %2678 = vadd.xlane.f32.xlu0 %v3615_v4 }
 0x68f   : > { %v3619_v6 = vpop.eup %3618 }
 0x690   : > { %v3621_v7 = vpop.eup %3620  ;;  %2684 = vadd.xlane.f32.xlu1 %v3619_v6 }
 0x691   : > { %2674 = vadd.xlane.f32.xlu0 %v3621_v7  ;;  %v3623_v8 = vpop.eup %3622 }
 0x692   : > { %v3625_v9 = vpop.eup %3624 }
 0x695   : > { %2682 = vadd.xlane.f32.xlu0 %v3623_v8 }
 0x699   : > { %2686 = vadd.xlane.f32.xlu0 %v3625_v9 }
 0x700   : > { %v2661_v10 = vpop.xlane.xlu1 %2660 }
 0x701   : > { %3626 = vlog2.f32 %v2661_v10 }
 0x704   : > { %v2657_v12 = vpop.xlane.xlu1 %2656 }
 0x705   : > { %3628 = vlog2.f32 %v2657_v12 }
 0x708   : > { %v2669_v13 = vpop.xlane.xlu1 %2668 }
 0x709   : > { %3630 = vlog2.f32 %v2669_v13  ;;  %v2663_v28 = vpop.xlane.xlu0 %2662 }
 0x70a   : > { %3632 = vlog2.f32 %v2663_v28 }
 0x70b   : > { %v3627_v31 = vpop.eup %3626 }
 0x70c   : > { %v2693_v44 = vmul.f32 0.6931472, %v3627_v31  ;;  %v2665_v42 = vpop.xlane.xlu1 %2664 }
 0x70d   : > { %3634 = vlog2.f32 %v2665_v42  ;;  %v2659_v45 = vpop.xlane.xlu0 %2658 }
 0x70e   : > { %v2722_v14 = vsub.f32 %v4467_v11, %v2693_v44  ;;  %3636 = vlog2.f32 %v2659_v45 }
 0x70f   : > { %v3629_v15 = vpop.eup %3628 }
 0x710   : > { %2738 = vst [vmem:[%s4606_s12 + $0x10] sm:$0xff] %v2722_v14  ;;  %v2689_v34 = vmul.f32 0.6931472, %v3629_v15  ;;  %v2677_v47 = vpop.xlane.xlu1 %2676 }
 0x711   : > { %3638 = vlog2.f32 %v2677_v47  ;;  %v2671_v49 = vpop.xlane.xlu0 %2670 }
 0x712   : > { %v2720_v52 = vsub.f32 %v4470_v29, %v2689_v34  ;;  %3640 = vlog2.f32 %v2671_v49 }
 0x713   : > { %v3631_v57 = vpop.eup %3630 }
 0x714   : > { %v3633_v54 = vpop.eup %3632  ;;  %2736 = vst [vmem:[%s4606_s12] sm:$0xff] %v2720_v52  ;;  %v2701_v11 = vmul.f32 0.6931472, %v3631_v57  ;;  %v2673_v55 = vpop.xlane.xlu1 %2672 }
 0x715   : > { %v2695_v62 = vmul.f32 0.6931472, %v3633_v54  ;;  %3642 = vlog2.f32 %v2673_v55  ;;  %v2667_v46 = vpop.xlane.xlu0 %2666 }
 0x716   : > { %v2726_v63 = vsub.f32 %v4473_v30, %v2701_v11  ;;  %3644 = vlog2.f32 %v2667_v46 }
 0x717   : > { %v3635_v59 = vpop.eup %3634  ;;  %v2723_v51 = vsub.f32 %v4475_v56, %v2695_v62 }
 0x718   : > { %v3637_v60 = vpop.eup %3636  ;;  %2742 = vst [vmem:[%s4606_s12 + $0x30] sm:$0xff] %v2726_v63  ;;  %v2697_v29 = vmul.f32 0.6931472, %v3635_v59 }
 0x719   : > { %2739 = vst [vmem:[%s4606_s12 + $0x18] sm:$0xff] %v2723_v51  ;;  %v2691_v50 = vmul.f32 0.6931472, %v3637_v60  ;;  %v2681_v37 = vpop.xlane.xlu1 %2680  ;;  %v2679_v33 = vpop.xlane.xlu0 %2678 }
 0x71a   : > { %v2724_v35 = vsub.f32 %v4482_v36, %v2697_v29  ;;  %3646 = vlog2.f32 %v2681_v37 }
 0x71b   : > { %v3639_v30 = vpop.eup %3638  ;;  %v2721_v40 = vsub.f32 %v4478_v38, %v2691_v50  ;;  %3648 = vlog2.f32 %v2679_v33 }
 0x71c   : > { %v3641_v56 = vpop.eup %3640  ;;  %2740 = vst [vmem:[%s4606_s12 + $0x20] sm:$0xff] %v2724_v35  ;;  %v2709_v1 = vmul.f32 0.6931472, %v3639_v30 }
 0x71d   : > { %2737 = vst [vmem:[%s4606_s12 + $0x8] sm:$0xff] %v2721_v40  ;;  %v2703_v39 = vmul.f32 0.6931472, %v3641_v56  ;;  %v2685_v16 = vpop.xlane.xlu1 %2684 }
 0x71e   : > { %v2675_v18 = vpop.xlane.xlu0 %2674  ;;  %v2730_v36 = vsub.f32 %v4488_v58, %v2709_v1  ;;  %3650 = vlog2.f32 %v2685_v16 }
 0x71f   : > { %v3643_v17 = vpop.eup %3642  ;;  %v2727_v38 = vsub.f32 %v4485_v41, %v2703_v39  ;;  %3652 = vlog2.f32 %v2675_v18 }
 0x720   : > { %v3645_v24 = vpop.eup %3644  ;;  %2746 = vst [vmem:[%s4606_s12 + $0x50] sm:$0xff] %v2730_v36  ;;  %v2705_v26 = vmul.f32 0.6931472, %v3643_v17 }
 0x721   : > { %2743 = vst [vmem:[%s4606_s12 + $0x38] sm:$0xff] %v2727_v38  ;;  %v2699_v27 = vmul.f32 0.6931472, %v3645_v24 }
 0x722   : > { %v2683_v20 = vpop.xlane.xlu0 %2682  ;;  %v2728_v21 = vsub.f32 %v4494_v32, %v2705_v26 }
 0x723   : > { %3654 = vlog2.f32 %v2683_v20  ;;  %v2725_v58 = vsub.f32 %v4491_v61, %v2699_v27 }
 0x724   : > { %v3647_v23 = vpop.eup %3646  ;;  %2744 = vst [vmem:[%s4606_s12 + $0x40] sm:$0xff] %v2728_v21 }
 0x725   : > { %v3649_v41 = vpop.eup %3648  ;;  %2741 = vst [vmem:[%s4606_s12 + $0x28] sm:$0xff] %v2725_v58  ;;  %v2713_v48 = vmul.f32 0.6931472, %v3647_v23 }
 0x726   : > { %v2687_v2 = vpop.xlane.xlu0 %2686  ;;  %v2711_v3 = vmul.f32 0.6931472, %v3649_v41 }
 0x727   : > { %3656 = vlog2.f32 %v2687_v2  ;;  %v2732_v4 = vsub.f32 %v4502_v43, %v2713_v48 }
 0x728   : > { %v3651_v32 = vpop.eup %3650  ;;  %v2731_v5 = vsub.f32 %v4496_v53, %v2711_v3 }
 0x729   : > { %v3653_v61 = vpop.eup %3652  ;;  %2748 = vst [vmem:[%s4606_s12 + $0x60] sm:$0xff] %v2732_v4  ;;  %v2717_v6 = vmul.f32 0.6931472, %v3651_v32 }
 0x72a   : > { %2747 = vst [vmem:[%s4606_s12 + $0x58] sm:$0xff] %v2731_v5  ;;  %v2707_v7 = vmul.f32 0.6931472, %v3653_v61 }
 0x72b   : > { %v2734_v8 = vsub.f32 %v4509_v19, %v2717_v6 }
 0x72c   : > { %v2729_v10 = vsub.f32 %v4505_v0, %v2707_v7 }
 0x72d   : > { %v3655_v9 = vpop.eup %3654  ;;  %2750 = vst [vmem:[%s4606_s12 + $0x70] sm:$0xff] %v2734_v8 }
 0x72e   : > { %v2715_v53 = vmul.f32 0.6931472, %v3655_v9  ;;  %2745 = vst [vmem:[%s4606_s12 + $0x48] sm:$0xff] %v2729_v10 }
 0x730   : > { %v2733_v43 = vsub.f32 %v4513_v25, %v2715_v53 }
 0x731   : > { %v3657_v12 = vpop.eup %3656 }
 0x732   : > { %2749 = vst [vmem:[%s4606_s12 + $0x68] sm:$0xff] %v2733_v43  ;;  %v2719_v19 = vmul.f32 0.6931472, %v3657_v12 }
 0x734   : > { %v2735_v13 = vsub.f32 %v4518_v22, %v2719_v19 }
 0x736   : > { %2751 = vst [vmem:[%s4606_s12 + $0x78] sm:$0xff] %v2735_v13 }
 0x737 PF: > { %s24_s27 = sadd.s32 1, %s3680_s27   ;;  %s4614_s25 = smov %s3676_s26 }
 0x738   : > { %p21_p7 = scmp.ge.s32.totalorder %s24_s27, 5   ;;  %s4615_s26 = smov %s4617_s28 }
 0x73a   :  { %23 = sbr.rel (!%p21_p7) target bundleno = 2 (0x2), region = 126 }

</bundles_post_ra>
